<compile_context>
chip_gen: v7x
topology: tpu7x:2x2x1
jax: 0.10.0
libtpu: 0.0.40
codegen_flags: <defaults>
</compile_context>

<pallas_src>
import functools

import jax
import jax.numpy as jnp
import numpy as np
from jax.experimental import pallas as pl
from jax.experimental.pallas import tpu as pltpu

_LANE = 128   # lane-pad channel dims to full vreg lane tiles
_ROW = 16     # sublane-pad spatial (Pout) dims to bf16 sublane tiles


def _round_up(x, m):
    return (x + m - 1) // m * m


def _encoder_fused_kernel(bb, geom, x_ref,
                          s1_ref, w1_ref, b1_ref,
                          s2_ref, w2_ref, b2_ref,
                          s3_ref, w3_ref, b3_ref,
                          o_ref, p1_ref, p2_ref, p3_ref):
    """Fused 3x (VALID 3x3 conv + bias + ReLU) for a block of `bb` images.

    x_ref  : (bb*Pin1, 128)           bf16  channel-padded, row-major NHWC input
    s*_ref : (9*Pout_pad, Pin_pad)    bf16  stacked 0/1 tap-selection matrices
    w*_ref : (9*Cin_pad, Cout_pad)    bf16  tap-major conv weights
    b*_ref : (1, Cout_pad)            f32   bias
    p*_ref : (bb*Pout_pad, 9*Cin_pad) bf16  VMEM scratch for im2col patches
    o_ref  : (bb*Pout3_pad, Cout3)    f32   flattened output
    """

    def conv_relu(act, s_ref, w_ref, b_ref, patch_ref, pin_pad, pout_pad):
        cpad = act.shape[-1]                   # lane-padded Cin of this layer
        ntaps = s_ref.shape[0] // pout_pad     # 9
        for b in range(bb):
            # ONE stacked gather dot per image: all 9 taps at once.
            # (0/1 selection of bf16 values with f32 accumulation -> exact.)
            g = jnp.dot(s_ref[...], act[b * pin_pad:(b + 1) * pin_pad, :],
                        preferred_element_type=jnp.float32).astype(jnp.bfloat16)
            # Move each tap block (16-aligned rows) into its 128-aligned lane
            # slot of the patches scratch -> (Pout_pad, 9*Cin_pad) im2col tile.
            for t in range(ntaps):
                patch_ref[b * pout_pad:(b + 1) * pout_pad,
                          t * cpad:(t + 1) * cpad] = (
                    g[t * pout_pad:(t + 1) * pout_pad, :])
        # ONE K-fused weight dot for the whole block; MXU accumulates over K.
        out = jnp.dot(patch_ref[...], w_ref[...],
                      preferred_element_type=jnp.float32)
        return jnp.maximum(out + b_ref[...], 0.0)      # bias + ReLU in f32

    (pin1, po1), (pin2, po2), (pin3, po3) = geom
    a1 = conv_relu(x_ref[...], s1_ref, w1_ref, b1_ref, p1_ref, pin1, po1)
    a2 = conv_relu(a1.astype(jnp.bfloat16), s2_ref, w2_ref, b2_ref, p2_ref, pin2, po2)
    a3 = conv_relu(a2.astype(jnp.bfloat16), s3_ref, w3_ref, b3_ref, p3_ref, pin3, po3)
    o_ref[...] = a3.astype(o_ref.dtype)


def init_encoder_params(key, frame_stack):
    """Deterministic init matching nn.Conv2d default (uniform +/- 1/sqrt(fan_in))."""
    layer_defs = [(frame_stack * 10, 128, 2), (128, 64, 1), (64, 4, 2)]
    params = []
    for cin, cout, stride in layer_defs:
        key, kw_, kb_ = jax.random.split(key, 3)
        bound = 1.0 / np.sqrt(cin * 3 * 3)
        w = jax.random.uniform(kw_, (cout, cin, 3, 3), jnp.float32, -bound, bound)
        b = jax.random.uniform(kb_, (cout,), jnp.float32, -bound, bound)
        params.append((w, b, stride))
    return params


def build_encoder_plan(h, w, params):
    """Host-side precompute: stacked 0/1 selection matrices (im2col-as-matmul),
    tap-major channel-padded weights (bf16), padded biases, and geometry."""
    plan = []
    ih, iw = h, w
    cin_pad = _LANE                           # layer-1 input channels 10 -> 128
    pin_pad = _round_up(ih * iw, _ROW)
    n_layers = len(params)
    for idx, (weight, bias, stride) in enumerate(params):
        weight = np.asarray(weight, np.float32)
        bias = np.asarray(bias, np.float32)
        cout, cin, kh, kw = weight.shape
        oh = (ih - kh) // stride + 1
        ow = (iw - kw) // stride + 1
        pout = oh * ow
        pout_pad = _round_up(pout, _ROW)
        last = idx == n_layers - 1
        cout_pad = cout if last else _round_up(cout, _LANE)

        # Stacked selection: row t*pout_pad + (r*ow + c) picks input row
        # (stride*r + i)*iw + (stride*c + j), tap t = i*kw + j. Pad rows stay 0.
        sel = np.zeros((kh * kw * pout_pad, pin_pad), np.float32)
        for i in range(kh):
            for j in range(kw):
                t = i * kw + j
                for r in range(oh):
                    for c in range(ow):
                        q = (stride * r + i) * iw + (stride * c + j)
                        sel[t * pout_pad + r * ow + c, q] = 1.0

        # Tap-major, channel-padded weights: (9*Cin_pad, Cout_pad).
        w_hw = np.transpose(weight, (2, 3, 1, 0))          # (kh, kw, cin, cout)
        w2d = np.zeros((kh * kw * cin_pad, cout_pad), np.float32)
        for i in range(kh):
            for j in range(kw):
                t = i * kw + j
                w2d[t * cin_pad:t * cin_pad + cin, :cout] = w_hw[i, j]

        b2d = np.zeros((1, cout_pad), np.float32)
        b2d[0, :cout] = bias

        plan.append(dict(
            S=jnp.asarray(sel, jnp.bfloat16),
            W=jnp.asarray(w2d, jnp.bfloat16),
            b=jnp.asarray(b2d, jnp.float32),
            pin_pad=pin_pad, pout_pad=pout_pad,
            cin_pad=cin_pad, cout_pad=cout_pad,
            oh=oh, ow=ow, cout=cout))

        ih, iw = oh, ow
        pin_pad = pout_pad
        cin_pad = cout_pad
    return plan


def encoder_forward_pallas(x_nchw, plan):
    n, c, h, w = x_nchw.shape
    l1, l2, l3 = plan

    # Batch blocking: fold `bb` images into the matmul M dimension per grid step;
    # keep >= 2 grid steps when n >= 2 so both v7x TensorCores get work.
    nblocks = 2 if n >= 2 else 1
    bb = -(-n // nblocks)
    n_pad = nblocks * bb

    # NCHW -> (N, H*W, C); zero-pad batch/rows/channels; cast bf16 (dense lanes).
    x2d = jnp.transpose(x_nchw, (0, 2, 3, 1)).reshape(n, h * w, c)
    x2d = jnp.pad(x2d, ((0, n_pad - n),
                        (0, l1['pin_pad'] - h * w),
                        (0, l1['cin_pad'] - c)))
    x2d = x2d.astype(jnp.bfloat16).reshape(nblocks, bb * l1['pin_pad'], l1['cin_pad'])

    geom = ((l1['pin_pad'], l1['pout_pad']),
            (l2['pin_pad'], l2['pout_pad']),
            (l3['pin_pad'], l3['pout_pad']))
    kernel = functools.partial(_encoder_fused_kernel, bb, geom)

    out = pl.pallas_call(
        kernel,
        out_shape=jax.ShapeDtypeStruct(
            (nblocks, bb * l3['pout_pad'], l3['cout_pad']), jnp.float32),
        grid=(nblocks,),
        in_specs=[
            # per-block input tile (leading batch-block dim squeezed out)
            pl.BlockSpec((None, bb * l1['pin_pad'], l1['cin_pad']),
                         lambda i: (i, 0, 0)),
            # constants: full-array blocks, constant index_map -> DMA'd once,
            # VMEM-resident for the whole grid.
            pl.BlockSpec(l1['S'].shape, lambda i: (0, 0)),
            pl.BlockSpec(l1['W'].shape, lambda i: (0, 0)),
            pl.BlockSpec(l1['b'].shape, lambda i: (0, 0)),
            pl.BlockSpec(l2['S'].shape, lambda i: (0, 0)),
            pl.BlockSpec(l2['W'].shape, lambda i: (0, 0)),
            pl.BlockSpec(l2['b'].shape, lambda i: (0, 0)),
            pl.BlockSpec(l3['S'].shape, lambda i: (0, 0)),
            pl.BlockSpec(l3['W'].shape, lambda i: (0, 0)),
            pl.BlockSpec(l3['b'].shape, lambda i: (0, 0)),
        ],
        out_specs=pl.BlockSpec((None, bb * l3['pout_pad'], l3['cout_pad']),
                               lambda i: (i, 0, 0)),
        scratch_shapes=[
            pltpu.VMEM((bb * l1['pout_pad'], l1['W'].shape[0]), jnp.bfloat16),
            pltpu.VMEM((bb * l2['pout_pad'], l2['W'].shape[0]), jnp.bfloat16),
            pltpu.VMEM((bb * l3['pout_pad'], l3['W'].shape[0]), jnp.bfloat16),
        ],
        compiler_params=pltpu.CompilerParams(
            dimension_semantics=("parallel",)),   # batch-block axis -> both v7x TCs
    )(x2d,
      l1['S'], l1['W'], l1['b'],
      l2['S'], l2['W'], l2['b'],
      l3['S'], l3['W'], l3['b'])

    out = out.reshape(n_pad, l3['pout_pad'], l3['cout_pad'])
    out = out[:n, :l3['oh'] * l3['ow'], :l3['cout']]
    out = out.reshape(n, l3['oh'], l3['ow'], l3['cout'])
    return jnp.transpose(out, (0, 3, 1, 2))       # NHWC -> NCHW


def encoder_reference(x_nchw, params):
    """Pure-JAX f32 reference (XLA conv) for correctness checking."""
    x = x_nchw
    for w, b, stride in params:
        x = jax.lax.conv_general_dilated(
            x, w, window_strides=(stride, stride), padding="VALID",
            dimension_numbers=("NCHW", "OIHW", "NCHW"))
        x = jnp.maximum(x + b[None, :, None, None], 0.0)
    return x


if __name__ == "__main__":
    key = jax.random.PRNGKey(0)
    k_x, k_p = jax.random.split(key)

    frame_stack = 1                                       # config.frame_stack
    x = jax.random.normal(k_x, (2, frame_stack * 10, 16, 16), jnp.float32)
    params = init_encoder_params(k_p, frame_stack)
    plan = build_encoder_plan(16, 16, params)

    fwd = jax.jit(functools.partial(encoder_forward_pallas, plan=plan))
    out = jax.block_until_ready(fwd(x))
    ref = jax.block_until_ready(encoder_reference(x, params))

    # 16 -> 7 (stride 2) -> 5 (stride 1) -> 2 (stride 2), channels 10->128->64->4
    assert out.shape == (2, 4, 2, 2), out.shape
    # bf16 operands / f32 accumulation -> ~1e-2 relative difference vs f32 reference
    # (intentional precision choice, see header comment).
    if not np.allclose(np.asarray(out), np.asarray(ref), rtol=2e-2, atol=2e-2):
        max_err = float(np.max(np.abs(np.asarray(out) - np.asarray(ref))))
        raise AssertionError(
            f"Pallas encoder output mismatch vs XLA reference (max |diff|={max_err})")

    print("KERNEL_OK")
</pallas_src>

<mosaic_0001>
module attributes {stable_mosaic.version = 11 : i64} {
  func.func @_encoder_fused_kernel(%arg0: i32, %arg1: memref<1x256x128xbf16, #tpu.memory_space<vmem>>, %arg2: memref<576x256xbf16, #tpu.memory_space<vmem>>, %arg3: memref<1152x128xbf16, #tpu.memory_space<vmem>>, %arg4: memref<1x128xf32, #tpu.memory_space<vmem>>, %arg5: memref<288x64xbf16, #tpu.memory_space<vmem>>, %arg6: memref<1152x128xbf16, #tpu.memory_space<vmem>>, %arg7: memref<1x128xf32, #tpu.memory_space<vmem>>, %arg8: memref<144x32xbf16, #tpu.memory_space<vmem>>, %arg9: memref<1152x4xbf16, #tpu.memory_space<vmem>>, %arg10: memref<1x4xf32, #tpu.memory_space<vmem>>, %arg11: memref<1x16x4xf32, #tpu.memory_space<vmem>>, %arg12: memref<64x1152xbf16, #tpu.memory_space<vmem>>, %arg13: memref<32x1152xbf16, #tpu.memory_space<vmem>>, %arg14: memref<16x1152xbf16, #tpu.memory_space<vmem>>) attributes {dimension_semantics = [#tpu.dimension_semantics<parallel>], iteration_bounds = array<i64: 2>, scalar_prefetch = 0 : i64, scratch_operands = 3 : i64, tpu.core_type = #tpu.core_type<tc>, window_params = [{transform_indices = @transform_0, window_bounds = array<i64: 1, 256, 128>}, {pipeline_mode = #tpu.pipeline_mode<synchronous>, transform_indices = @transform_1, window_bounds = array<i64: 576, 256>}, {pipeline_mode = #tpu.pipeline_mode<synchronous>, transform_indices = @transform_2, window_bounds = array<i64: 1152, 128>}, {pipeline_mode = #tpu.pipeline_mode<synchronous>, transform_indices = @transform_3, window_bounds = array<i64: 1, 128>}, {pipeline_mode = #tpu.pipeline_mode<synchronous>, transform_indices = @transform_4, window_bounds = array<i64: 288, 64>}, {pipeline_mode = #tpu.pipeline_mode<synchronous>, transform_indices = @transform_5, window_bounds = array<i64: 1152, 128>}, {pipeline_mode = #tpu.pipeline_mode<synchronous>, transform_indices = @transform_6, window_bounds = array<i64: 1, 128>}, {pipeline_mode = #tpu.pipeline_mode<synchronous>, transform_indices = @transform_7, window_bounds = array<i64: 144, 32>}, {pipeline_mode = #tpu.pipeline_mode<synchronous>, transform_indices = @transform_8, window_bounds = array<i64: 1152, 4>}, {pipeline_mode = #tpu.pipeline_mode<synchronous>, transform_indices = @transform_9, window_bounds = array<i64: 1, 4>}, {transform_indices = @transform_10, window_bounds = array<i64: 1, 16, 4>}]} {
    %c0 = arith.constant 0 : index
    %c0_0 = arith.constant 0 : index
    %c0_1 = arith.constant 0 : index
    %0 = vector.load %arg1[%c0, %c0_0, %c0_1] : memref<1x256x128xbf16, #tpu.memory_space<vmem>>, vector<1x256x128xbf16>
    %1 = vector.shape_cast %0 : vector<1x256x128xbf16> to vector<256x128xbf16>
    %c0_2 = arith.constant 0 : index
    %c0_3 = arith.constant 0 : index
    %2 = vector.load %arg2[%c0_2, %c0_3] : memref<576x256xbf16, #tpu.memory_space<vmem>>, vector<576x256xbf16>
    %cst = arith.constant dense<0.000000e+00> : vector<576x128xf32>
    %3 = tpu.matmul %2, %1, %cst {dimension_numbers = #tpu.dot_dimension_numbers<[1], [0], [0], [1], [0, 0, 1, 1], [], []>} : vector<576x256xbf16>, vector<256x128xbf16>, vector<576x128xf32> -> vector<576x128xf32>
    %4 = arith.truncf %3 : vector<576x128xf32> to vector<576x128xbf16>
    %5 = vector.extract_strided_slice %4 {offsets = [0, 0], sizes = [64, 128], strides = [1, 1]} : vector<576x128xbf16> to vector<64x128xbf16>
    %c0_4 = arith.constant 0 : index
    %c0_5 = arith.constant 0 : index
    %6 = vector.load %arg12[%c0_4, %c0_5] : memref<64x1152xbf16, #tpu.memory_space<vmem>>, vector<64x128xbf16>
    tpu.vector_store %arg12[%c0_4, %c0_5], %5 {strides = array<i32>} : memref<64x1152xbf16, #tpu.memory_space<vmem>>, vector<64x128xbf16>,
    %7 = vector.extract_strided_slice %4 {offsets = [64, 0], sizes = [64, 128], strides = [1, 1]} : vector<576x128xbf16> to vector<64x128xbf16>
    %c0_6 = arith.constant 0 : index
    %c128 = arith.constant 128 : index
    %8 = vector.load %arg12[%c0_6, %c128] : memref<64x1152xbf16, #tpu.memory_space<vmem>>, vector<64x128xbf16>
    tpu.vector_store %arg12[%c0_6, %c128], %7 {strides = array<i32>} : memref<64x1152xbf16, #tpu.memory_space<vmem>>, vector<64x128xbf16>,
    %9 = vector.extract_strided_slice %4 {offsets = [128, 0], sizes = [64, 128], strides = [1, 1]} : vector<576x128xbf16> to vector<64x128xbf16>
    %c0_7 = arith.constant 0 : index
    %c256 = arith.constant 256 : index
    %10 = vector.load %arg12[%c0_7, %c256] : memref<64x1152xbf16, #tpu.memory_space<vmem>>, vector<64x128xbf16>
    tpu.vector_store %arg12[%c0_7, %c256], %9 {strides = array<i32>} : memref<64x1152xbf16, #tpu.memory_space<vmem>>, vector<64x128xbf16>,
    %11 = vector.extract_strided_slice %4 {offsets = [192, 0], sizes = [64, 128], strides = [1, 1]} : vector<576x128xbf16> to vector<64x128xbf16>
    %c0_8 = arith.constant 0 : index
    %c384 = arith.constant 384 : index
    %12 = vector.load %arg12[%c0_8, %c384] : memref<64x1152xbf16, #tpu.memory_space<vmem>>, vector<64x128xbf16>
    tpu.vector_store %arg12[%c0_8, %c384], %11 {strides = array<i32>} : memref<64x1152xbf16, #tpu.memory_space<vmem>>, vector<64x128xbf16>,
    %13 = vector.extract_strided_slice %4 {offsets = [256, 0], sizes = [64, 128], strides = [1, 1]} : vector<576x128xbf16> to vector<64x128xbf16>
    %c0_9 = arith.constant 0 : index
    %c512 = arith.constant 512 : index
    %14 = vector.load %arg12[%c0_9, %c512] : memref<64x1152xbf16, #tpu.memory_space<vmem>>, vector<64x128xbf16>
    tpu.vector_store %arg12[%c0_9, %c512], %13 {strides = array<i32>} : memref<64x1152xbf16, #tpu.memory_space<vmem>>, vector<64x128xbf16>,
    %15 = vector.extract_strided_slice %4 {offsets = [320, 0], sizes = [64, 128], strides = [1, 1]} : vector<576x128xbf16> to vector<64x128xbf16>
    %c0_10 = arith.constant 0 : index
    %c640 = arith.constant 640 : index
    %16 = vector.load %arg12[%c0_10, %c640] : memref<64x1152xbf16, #tpu.memory_space<vmem>>, vector<64x128xbf16>
    tpu.vector_store %arg12[%c0_10, %c640], %15 {strides = array<i32>} : memref<64x1152xbf16, #tpu.memory_space<vmem>>, vector<64x128xbf16>,
    %17 = vector.extract_strided_slice %4 {offsets = [384, 0], sizes = [64, 128], strides = [1, 1]} : vector<576x128xbf16> to vector<64x128xbf16>
    %c0_11 = arith.constant 0 : index
    %c768 = arith.constant 768 : index
    %18 = vector.load %arg12[%c0_11, %c768] : memref<64x1152xbf16, #tpu.memory_space<vmem>>, vector<64x128xbf16>
    tpu.vector_store %arg12[%c0_11, %c768], %17 {strides = array<i32>} : memref<64x1152xbf16, #tpu.memory_space<vmem>>, vector<64x128xbf16>,
    %19 = vector.extract_strided_slice %4 {offsets = [448, 0], sizes = [64, 128], strides = [1, 1]} : vector<576x128xbf16> to vector<64x128xbf16>
    %c0_12 = arith.constant 0 : index
    %c896 = arith.constant 896 : index
    %20 = vector.load %arg12[%c0_12, %c896] : memref<64x1152xbf16, #tpu.memory_space<vmem>>, vector<64x128xbf16>
    tpu.vector_store %arg12[%c0_12, %c896], %19 {strides = array<i32>} : memref<64x1152xbf16, #tpu.memory_space<vmem>>, vector<64x128xbf16>,
    %21 = vector.extract_strided_slice %4 {offsets = [512, 0], sizes = [64, 128], strides = [1, 1]} : vector<576x128xbf16> to vector<64x128xbf16>
    %c0_13 = arith.constant 0 : index
    %c1024 = arith.constant 1024 : index
    %22 = vector.load %arg12[%c0_13, %c1024] : memref<64x1152xbf16, #tpu.memory_space<vmem>>, vector<64x128xbf16>
    tpu.vector_store %arg12[%c0_13, %c1024], %21 {strides = array<i32>} : memref<64x1152xbf16, #tpu.memory_space<vmem>>, vector<64x128xbf16>,
    %c0_14 = arith.constant 0 : index
    %c0_15 = arith.constant 0 : index
    %23 = vector.load %arg12[%c0_14, %c0_15] : memref<64x1152xbf16, #tpu.memory_space<vmem>>, vector<64x1152xbf16>
    %c0_16 = arith.constant 0 : index
    %c0_17 = arith.constant 0 : index
    %24 = vector.load %arg3[%c0_16, %c0_17] : memref<1152x128xbf16, #tpu.memory_space<vmem>>, vector<1152x128xbf16>
    %cst_18 = arith.constant dense<0.000000e+00> : vector<64x128xf32>
    %25 = tpu.matmul %23, %24, %cst_18 {dimension_numbers = #tpu.dot_dimension_numbers<[1], [0], [0], [1], [0, 0, 1, 1], [], []>} : vector<64x1152xbf16>, vector<1152x128xbf16>, vector<64x128xf32> -> vector<64x128xf32>
    %c0_19 = arith.constant 0 : index
    %c0_20 = arith.constant 0 : index
    %26 = vector.load %arg4[%c0_19, %c0_20] : memref<1x128xf32, #tpu.memory_space<vmem>>, vector<1x128xf32>
    %27 = vector.broadcast %26 : vector<1x128xf32> to vector<64x128xf32>
    %28 = arith.addf %25, %27 : vector<64x128xf32>
    %cst_21 = arith.constant 0.000000e+00 : f32
    %29 = vector.broadcast %cst_21 : f32 to vector<64x128xf32>
    %30 = arith.maximumf %28, %29 : vector<64x128xf32>
    %31 = arith.truncf %30 : vector<64x128xf32> to vector<64x128xbf16>
    %c0_22 = arith.constant 0 : index
    %c0_23 = arith.constant 0 : index
    %32 = vector.load %arg5[%c0_22, %c0_23] : memref<288x64xbf16, #tpu.memory_space<vmem>>, vector<288x64xbf16>
    %cst_24 = arith.constant dense<0.000000e+00> : vector<288x128xf32>
    %33 = tpu.matmul %32, %31, %cst_24 {dimension_numbers = #tpu.dot_dimension_numbers<[1], [0], [0], [1], [0, 0, 1, 1], [], []>} : vector<288x64xbf16>, vector<64x128xbf16>, vector<288x128xf32> -> vector<288x128xf32>
    %34 = arith.truncf %33 : vector<288x128xf32> to vector<288x128xbf16>
    %35 = vector.extract_strided_slice %34 {offsets = [0, 0], sizes = [32, 128], strides = [1, 1]} : vector<288x128xbf16> to vector<32x128xbf16>
    %c0_25 = arith.constant 0 : index
    %c0_26 = arith.constant 0 : index
    %36 = vector.load %arg13[%c0_25, %c0_26] : memref<32x1152xbf16, #tpu.memory_space<vmem>>, vector<32x128xbf16>
    tpu.vector_store %arg13[%c0_25, %c0_26], %35 {strides = array<i32>} : memref<32x1152xbf16, #tpu.memory_space<vmem>>, vector<32x128xbf16>,
    %37 = vector.extract_strided_slice %34 {offsets = [32, 0], sizes = [32, 128], strides = [1, 1]} : vector<288x128xbf16> to vector<32x128xbf16>
    %c0_27 = arith.constant 0 : index
    %c128_28 = arith.constant 128 : index
    %38 = vector.load %arg13[%c0_27, %c128_28] : memref<32x1152xbf16, #tpu.memory_space<vmem>>, vector<32x128xbf16>
    tpu.vector_store %arg13[%c0_27, %c128_28], %37 {strides = array<i32>} : memref<32x1152xbf16, #tpu.memory_space<vmem>>, vector<32x128xbf16>,
    %39 = vector.extract_strided_slice %34 {offsets = [64, 0], sizes = [32, 128], strides = [1, 1]} : vector<288x128xbf16> to vector<32x128xbf16>
    %c0_29 = arith.constant 0 : index
    %c256_30 = arith.constant 256 : index
    %40 = vector.load %arg13[%c0_29, %c256_30] : memref<32x1152xbf16, #tpu.memory_space<vmem>>, vector<32x128xbf16>
    tpu.vector_store %arg13[%c0_29, %c256_30], %39 {strides = array<i32>} : memref<32x1152xbf16, #tpu.memory_space<vmem>>, vector<32x128xbf16>,
    %41 = vector.extract_strided_slice %34 {offsets = [96, 0], sizes = [32, 128], strides = [1, 1]} : vector<288x128xbf16> to vector<32x128xbf16>
    %c0_31 = arith.constant 0 : index
    %c384_32 = arith.constant 384 : index
    %42 = vector.load %arg13[%c0_31, %c384_32] : memref<32x1152xbf16, #tpu.memory_space<vmem>>, vector<32x128xbf16>
    tpu.vector_store %arg13[%c0_31, %c384_32], %41 {strides = array<i32>} : memref<32x1152xbf16, #tpu.memory_space<vmem>>, vector<32x128xbf16>,
    %43 = vector.extract_strided_slice %34 {offsets = [128, 0], sizes = [32, 128], strides = [1, 1]} : vector<288x128xbf16> to vector<32x128xbf16>
    %c0_33 = arith.constant 0 : index
    %c512_34 = arith.constant 512 : index
    %44 = vector.load %arg13[%c0_33, %c512_34] : memref<32x1152xbf16, #tpu.memory_space<vmem>>, vector<32x128xbf16>
    tpu.vector_store %arg13[%c0_33, %c512_34], %43 {strides = array<i32>} : memref<32x1152xbf16, #tpu.memory_space<vmem>>, vector<32x128xbf16>,
    %45 = vector.extract_strided_slice %34 {offsets = [160, 0], sizes = [32, 128], strides = [1, 1]} : vector<288x128xbf16> to vector<32x128xbf16>
    %c0_35 = arith.constant 0 : index
    %c640_36 = arith.constant 640 : index
    %46 = vector.load %arg13[%c0_35, %c640_36] : memref<32x1152xbf16, #tpu.memory_space<vmem>>, vector<32x128xbf16>
    tpu.vector_store %arg13[%c0_35, %c640_36], %45 {strides = array<i32>} : memref<32x1152xbf16, #tpu.memory_space<vmem>>, vector<32x128xbf16>,
    %47 = vector.extract_strided_slice %34 {offsets = [192, 0], sizes = [32, 128], strides = [1, 1]} : vector<288x128xbf16> to vector<32x128xbf16>
    %c0_37 = arith.constant 0 : index
    %c768_38 = arith.constant 768 : index
    %48 = vector.load %arg13[%c0_37, %c768_38] : memref<32x1152xbf16, #tpu.memory_space<vmem>>, vector<32x128xbf16>
    tpu.vector_store %arg13[%c0_37, %c768_38], %47 {strides = array<i32>} : memref<32x1152xbf16, #tpu.memory_space<vmem>>, vector<32x128xbf16>,
    %49 = vector.extract_strided_slice %34 {offsets = [224, 0], sizes = [32, 128], strides = [1, 1]} : vector<288x128xbf16> to vector<32x128xbf16>
    %c0_39 = arith.constant 0 : index
    %c896_40 = arith.constant 896 : index
    %50 = vector.load %arg13[%c0_39, %c896_40] : memref<32x1152xbf16, #tpu.memory_space<vmem>>, vector<32x128xbf16>
    tpu.vector_store %arg13[%c0_39, %c896_40], %49 {strides = array<i32>} : memref<32x1152xbf16, #tpu.memory_space<vmem>>, vector<32x128xbf16>,
    %51 = vector.extract_strided_slice %34 {offsets = [256, 0], sizes = [32, 128], strides = [1, 1]} : vector<288x128xbf16> to vector<32x128xbf16>
    %c0_41 = arith.constant 0 : index
    %c1024_42 = arith.constant 1024 : index
    %52 = vector.load %arg13[%c0_41, %c1024_42] : memref<32x1152xbf16, #tpu.memory_space<vmem>>, vector<32x128xbf16>
    tpu.vector_store %arg13[%c0_41, %c1024_42], %51 {strides = array<i32>} : memref<32x1152xbf16, #tpu.memory_space<vmem>>, vector<32x128xbf16>,
    %c0_43 = arith.constant 0 : index
    %c0_44 = arith.constant 0 : index
    %53 = vector.load %arg13[%c0_43, %c0_44] : memref<32x1152xbf16, #tpu.memory_space<vmem>>, vector<32x1152xbf16>
    %c0_45 = arith.constant 0 : index
    %c0_46 = arith.constant 0 : index
    %54 = vector.load %arg6[%c0_45, %c0_46] : memref<1152x128xbf16, #tpu.memory_space<vmem>>, vector<1152x128xbf16>
    %cst_47 = arith.constant dense<0.000000e+00> : vector<32x128xf32>
    %55 = tpu.matmul %53, %54, %cst_47 {dimension_numbers = #tpu.dot_dimension_numbers<[1], [0], [0], [1], [0, 0, 1, 1], [], []>} : vector<32x1152xbf16>, vector<1152x128xbf16>, vector<32x128xf32> -> vector<32x128xf32>
    %c0_48 = arith.constant 0 : index
    %c0_49 = arith.constant 0 : index
    %56 = vector.load %arg7[%c0_48, %c0_49] : memref<1x128xf32, #tpu.memory_space<vmem>>, vector<1x128xf32>
    %57 = vector.broadcast %56 : vector<1x128xf32> to vector<32x128xf32>
    %58 = arith.addf %55, %57 : vector<32x128xf32>
    %cst_50 = arith.constant 0.000000e+00 : f32
    %59 = vector.broadcast %cst_50 : f32 to vector<32x128xf32>
    %60 = arith.maximumf %58, %59 : vector<32x128xf32>
    %61 = arith.truncf %60 : vector<32x128xf32> to vector<32x128xbf16>
    %c0_51 = arith.constant 0 : index
    %c0_52 = arith.constant 0 : index
    %62 = vector.load %arg8[%c0_51, %c0_52] : memref<144x32xbf16, #tpu.memory_space<vmem>>, vector<144x32xbf16>
    %cst_53 = arith.constant dense<0.000000e+00> : vector<144x128xf32>
    %63 = tpu.matmul %62, %61, %cst_53 {dimension_numbers = #tpu.dot_dimension_numbers<[1], [0], [0], [1], [0, 0, 1, 1], [], []>} : vector<144x32xbf16>, vector<32x128xbf16>, vector<144x128xf32> -> vector<144x128xf32>
    %64 = arith.truncf %63 : vector<144x128xf32> to vector<144x128xbf16>
    %65 = vector.extract_strided_slice %64 {offsets = [0, 0], sizes = [16, 128], strides = [1, 1]} : vector<144x128xbf16> to vector<16x128xbf16>
    %c0_54 = arith.constant 0 : index
    %c0_55 = arith.constant 0 : index
    %66 = vector.load %arg14[%c0_54, %c0_55] : memref<16x1152xbf16, #tpu.memory_space<vmem>>, vector<16x128xbf16>
    tpu.vector_store %arg14[%c0_54, %c0_55], %65 {strides = array<i32>} : memref<16x1152xbf16, #tpu.memory_space<vmem>>, vector<16x128xbf16>,
    %67 = vector.extract_strided_slice %64 {offsets = [16, 0], sizes = [16, 128], strides = [1, 1]} : vector<144x128xbf16> to vector<16x128xbf16>
    %c0_56 = arith.constant 0 : index
    %c128_57 = arith.constant 128 : index
    %68 = vector.load %arg14[%c0_56, %c128_57] : memref<16x1152xbf16, #tpu.memory_space<vmem>>, vector<16x128xbf16>
    tpu.vector_store %arg14[%c0_56, %c128_57], %67 {strides = array<i32>} : memref<16x1152xbf16, #tpu.memory_space<vmem>>, vector<16x128xbf16>,
    %69 = vector.extract_strided_slice %64 {offsets = [32, 0], sizes = [16, 128], strides = [1, 1]} : vector<144x128xbf16> to vector<16x128xbf16>
    %c0_58 = arith.constant 0 : index
    %c256_59 = arith.constant 256 : index
    %70 = vector.load %arg14[%c0_58, %c256_59] : memref<16x1152xbf16, #tpu.memory_space<vmem>>, vector<16x128xbf16>
    tpu.vector_store %arg14[%c0_58, %c256_59], %69 {strides = array<i32>} : memref<16x1152xbf16, #tpu.memory_space<vmem>>, vector<16x128xbf16>,
    %71 = vector.extract_strided_slice %64 {offsets = [48, 0], sizes = [16, 128], strides = [1, 1]} : vector<144x128xbf16> to vector<16x128xbf16>
    %c0_60 = arith.constant 0 : index
    %c384_61 = arith.constant 384 : index
    %72 = vector.load %arg14[%c0_60, %c384_61] : memref<16x1152xbf16, #tpu.memory_space<vmem>>, vector<16x128xbf16>
    tpu.vector_store %arg14[%c0_60, %c384_61], %71 {strides = array<i32>} : memref<16x1152xbf16, #tpu.memory_space<vmem>>, vector<16x128xbf16>,
    %73 = vector.extract_strided_slice %64 {offsets = [64, 0], sizes = [16, 128], strides = [1, 1]} : vector<144x128xbf16> to vector<16x128xbf16>
    %c0_62 = arith.constant 0 : index
    %c512_63 = arith.constant 512 : index
    %74 = vector.load %arg14[%c0_62, %c512_63] : memref<16x1152xbf16, #tpu.memory_space<vmem>>, vector<16x128xbf16>
    tpu.vector_store %arg14[%c0_62, %c512_63], %73 {strides = array<i32>} : memref<16x1152xbf16, #tpu.memory_space<vmem>>, vector<16x128xbf16>,
    %75 = vector.extract_strided_slice %64 {offsets = [80, 0], sizes = [16, 128], strides = [1, 1]} : vector<144x128xbf16> to vector<16x128xbf16>
    %c0_64 = arith.constant 0 : index
    %c640_65 = arith.constant 640 : index
    %76 = vector.load %arg14[%c0_64, %c640_65] : memref<16x1152xbf16, #tpu.memory_space<vmem>>, vector<16x128xbf16>
    tpu.vector_store %arg14[%c0_64, %c640_65], %75 {strides = array<i32>} : memref<16x1152xbf16, #tpu.memory_space<vmem>>, vector<16x128xbf16>,
    %77 = vector.extract_strided_slice %64 {offsets = [96, 0], sizes = [16, 128], strides = [1, 1]} : vector<144x128xbf16> to vector<16x128xbf16>
    %c0_66 = arith.constant 0 : index
    %c768_67 = arith.constant 768 : index
    %78 = vector.load %arg14[%c0_66, %c768_67] : memref<16x1152xbf16, #tpu.memory_space<vmem>>, vector<16x128xbf16>
    tpu.vector_store %arg14[%c0_66, %c768_67], %77 {strides = array<i32>} : memref<16x1152xbf16, #tpu.memory_space<vmem>>, vector<16x128xbf16>,
    %79 = vector.extract_strided_slice %64 {offsets = [112, 0], sizes = [16, 128], strides = [1, 1]} : vector<144x128xbf16> to vector<16x128xbf16>
    %c0_68 = arith.constant 0 : index
    %c896_69 = arith.constant 896 : index
    %80 = vector.load %arg14[%c0_68, %c896_69] : memref<16x1152xbf16, #tpu.memory_space<vmem>>, vector<16x128xbf16>
    tpu.vector_store %arg14[%c0_68, %c896_69], %79 {strides = array<i32>} : memref<16x1152xbf16, #tpu.memory_space<vmem>>, vector<16x128xbf16>,
    %81 = vector.extract_strided_slice %64 {offsets = [128, 0], sizes = [16, 128], strides = [1, 1]} : vector<144x128xbf16> to vector<16x128xbf16>
    %c0_70 = arith.constant 0 : index
    %c1024_71 = arith.constant 1024 : index
    %82 = vector.load %arg14[%c0_70, %c1024_71] : memref<16x1152xbf16, #tpu.memory_space<vmem>>, vector<16x128xbf16>
    tpu.vector_store %arg14[%c0_70, %c1024_71], %81 {strides = array<i32>} : memref<16x1152xbf16, #tpu.memory_space<vmem>>, vector<16x128xbf16>,
    %c0_72 = arith.constant 0 : index
    %c0_73 = arith.constant 0 : index
    %83 = vector.load %arg14[%c0_72, %c0_73] : memref<16x1152xbf16, #tpu.memory_space<vmem>>, vector<16x1152xbf16>
    %c0_74 = arith.constant 0 : index
    %c0_75 = arith.constant 0 : index
    %84 = vector.load %arg9[%c0_74, %c0_75] : memref<1152x4xbf16, #tpu.memory_space<vmem>>, vector<1152x4xbf16>
    %cst_76 = arith.constant dense<0.000000e+00> : vector<16x4xf32>
    %85 = tpu.matmul %83, %84, %cst_76 {dimension_numbers = #tpu.dot_dimension_numbers<[1], [0], [0], [1], [0, 0, 1, 1], [], []>} : vector<16x1152xbf16>, vector<1152x4xbf16>, vector<16x4xf32> -> vector<16x4xf32>
    %c0_77 = arith.constant 0 : index
    %c0_78 = arith.constant 0 : index
    %86 = vector.load %arg10[%c0_77, %c0_78] : memref<1x4xf32, #tpu.memory_space<vmem>>, vector<1x4xf32>
    %87 = vector.broadcast %86 : vector<1x4xf32> to vector<16x4xf32>
    %88 = arith.addf %85, %87 : vector<16x4xf32>
    %cst_79 = arith.constant 0.000000e+00 : f32
    %89 = vector.broadcast %cst_79 : f32 to vector<16x4xf32>
    %90 = arith.maximumf %88, %89 : vector<16x4xf32>
    %c0_80 = arith.constant 0 : index
    %c0_81 = arith.constant 0 : index
    %c0_82 = arith.constant 0 : index
    %91 = vector.load %arg11[%c0_80, %c0_81, %c0_82] : memref<1x16x4xf32, #tpu.memory_space<vmem>>, vector<1x16x4xf32>
    %92 = vector.shape_cast %91 : vector<1x16x4xf32> to vector<16x4xf32>
    %93 = vector.shape_cast %90 : vector<16x4xf32> to vector<1x16x4xf32>
    tpu.vector_store %arg11[%c0_80, %c0_81, %c0_82], %93 {strides = array<i32>} : memref<1x16x4xf32, #tpu.memory_space<vmem>>, vector<1x16x4xf32>,
    return
  }
  func.func @transform_0(%arg0: i32) -> (i32, i32, i32) {
    %c0_i32 = arith.constant 0 : i32
    %c0_i32_0 = arith.constant 0 : i32
    %c0_i32_1 = arith.constant 0 : i32
    return %arg0, %c0_i32, %c0_i32_0 : i32, i32, i32
  }
  func.func @transform_1(%arg0: i32) -> (i32, i32) {
    %c0_i32 = arith.constant 0 : i32
    %c0_i32_0 = arith.constant 0 : i32
    %c0_i32_1 = arith.constant 0 : i32
    return %c0_i32, %c0_i32_0 : i32, i32
  }
  func.func @transform_2(%arg0: i32) -> (i32, i32) {
    %c0_i32 = arith.constant 0 : i32
    %c0_i32_0 = arith.constant 0 : i32
    %c0_i32_1 = arith.constant 0 : i32
    return %c0_i32, %c0_i32_0 : i32, i32
  }
  func.func @transform_3(%arg0: i32) -> (i32, i32) {
    %c0_i32 = arith.constant 0 : i32
    %c0_i32_0 = arith.constant 0 : i32
    %c0_i32_1 = arith.constant 0 : i32
    return %c0_i32, %c0_i32_0 : i32, i32
  }
  func.func @transform_4(%arg0: i32) -> (i32, i32) {
    %c0_i32 = arith.constant 0 : i32
    %c0_i32_0 = arith.constant 0 : i32
    %c0_i32_1 = arith.constant 0 : i32
    return %c0_i32, %c0_i32_0 : i32, i32
  }
  func.func @transform_5(%arg0: i32) -> (i32, i32) {
    %c0_i32 = arith.constant 0 : i32
    %c0_i32_0 = arith.constant 0 : i32
    %c0_i32_1 = arith.constant 0 : i32
    return %c0_i32, %c0_i32_0 : i32, i32
  }
  func.func @transform_6(%arg0: i32) -> (i32, i32) {
    %c0_i32 = arith.constant 0 : i32
    %c0_i32_0 = arith.constant 0 : i32
    %c0_i32_1 = arith.constant 0 : i32
    return %c0_i32, %c0_i32_0 : i32, i32
  }
  func.func @transform_7(%arg0: i32) -> (i32, i32) {
    %c0_i32 = arith.constant 0 : i32
    %c0_i32_0 = arith.constant 0 : i32
    %c0_i32_1 = arith.constant 0 : i32
    return %c0_i32, %c0_i32_0 : i32, i32
  }
  func.func @transform_8(%arg0: i32) -> (i32, i32) {
    %c0_i32 = arith.constant 0 : i32
    %c0_i32_0 = arith.constant 0 : i32
    %c0_i32_1 = arith.constant 0 : i32
    return %c0_i32, %c0_i32_0 : i32, i32
  }
  func.func @transform_9(%arg0: i32) -> (i32, i32) {
    %c0_i32 = arith.constant 0 : i32
    %c0_i32_0 = arith.constant 0 : i32
    %c0_i32_1 = arith.constant 0 : i32
    return %c0_i32, %c0_i32_0 : i32, i32
  }
  func.func @transform_10(%arg0: i32) -> (i32, i32, i32) {
    %c0_i32 = arith.constant 0 : i32
    %c0_i32_0 = arith.constant 0 : i32
    %c0_i32_1 = arith.constant 0 : i32
    return %arg0, %c0_i32, %c0_i32_0 : i32, i32, i32
  }
}

</mosaic_0001>

<bundles_post_ra>
// kernel: encoder_forward_pallas.1
= control target key start
LH: loop header
LB: loop body
LE: loop exit
PB: predicated region body
PF: predicated region fallthrough
CT: control target
= control target key end

     0   :  { %s5977_s13 = smov 0   ;;  %s7105_s0 = inlined_call_operand.vmem [shape: bf16[2,256,128], index: 0, kind: input, shape index: {}]   ;;  %s7106_s1 = inlined_call_operand.vmem [shape: bf16[576,256], index: 1, kind: input, shape index: {}]   ;;  %s7107_s2 = inlined_call_operand.vmem [shape: bf16[1152,128], index: 2, kind: input, shape index: {}]   ;;  %s7108_s3 = inlined_call_operand.vmem [shape: f32[1,128], index: 3, kind: input, shape index: {}]   ;;  %s7109_s4 = inlined_call_operand.vmem [shape: bf16[288,64], index: 4, kind: input, shape index: {}]   ;;  %s7110_s5 = inlined_call_operand.vmem [shape: bf16[1152,128], index: 5, kind: input, shape index: {}]   ;;  %s7111_s6 = inlined_call_operand.vmem [shape: f32[1,128], index: 6, kind: input, shape index: {}]   ;;  %s7112_s7 = inlined_call_operand.vmem [shape: bf16[144,32], index: 7, kind: input, shape index: {}]   ;;  %s7113_s8 = inlined_call_operand.vmem [shape: bf16[1152,4], index: 8, kind: input, shape index: {}]   ;;  %s7114_s9 = inlined_call_operand.vmem [shape: f32[1,4], index: 9, kind: input, shape index: {}]   ;;  %s7115_s10 = inlined_call_operand.vmem [shape: f32[2,16,4], index: 10, kind: output, shape index: {}]  }
   0x1 LB: > { %s4587_s14 = sadd.s32 4294967295, %s5917_s13   ;;  %p4591_p0 = scmp.ge.s32.totalorder %s5917_s13, 1  ;;  %s5917_s13 = sphi %s5977_s13, %s20_s13  }
   0x2   : > { %p312_p1 = scmp.lt.s32.totalorder %s5917_s13, 3 }
   0x4   : > { %p313_p2 = pnand %p4591_p0, %p312_p1 }
   0x5   : > { %p350_p3 = scmp.lt.s32.totalorder (!%p313_p2), %s4587_s14, 1  ;;  %v5919_v0 = vmov (!%p313_p2), 0   ;;  %v5562_v1 = vld [vmem:[%s7106_s1 + $0x4] ss:$8 sps:$4 sm:$0xff] (!%p313_p2)   ;;  %v5560_v18 = vld [vmem:[%s7106_s1] ss:$8 sps:$4 sm:$0xff] (!%p313_p2)  }
   0x6   : > { %316 = sbr.rel (%p313_p2) target bundleno = 1876 (0x754), region = 60  ;;  %921 = vmatprep.subr.bf16.mxu0 (!%p313_p2), %v5919_v0  ;;  %953 = vmatprep.mubr.bf16.mxu0 (!%p313_p2), %v5562_v1  ;;  %v5563_v19 = vld [vmem:[%s7106_s1 + $0x14] ss:$8 sps:$4 sm:$0xff] (!%p313_p2)   ;;  %v5565_v20 = vld [vmem:[%s7106_s1 + $0x10] ss:$8 sps:$4 sm:$0xff] (!%p313_p2)   ;;  %v5644_v42 = vld [vmem:[%s7107_s2 + $0x40] sm:$0xff] (!%p313_p2)  }
   0x7   : > { %v5566_v21 = vld [vmem:[%s7106_s1 + $0x24] ss:$8 sps:$4 sm:$0xff] (!%p313_p2)   ;;  %v5568_v22 = vld [vmem:[%s7106_s1 + $0x20] ss:$8 sps:$4 sm:$0xff] (!%p313_p2)   ;;  %v5569_v23 = vld [vmem:[%s7106_s1 + $0x34] ss:$8 sps:$4 sm:$0xff] (!%p313_p2)   ;;  %4961 = vmatprep.subr.bf16.mxu1 (!%p313_p2), %v5644_v42 }
   0x8   : > { %v5571_v24 = vld [vmem:[%s7106_s1 + $0x30] ss:$8 sps:$4 sm:$0xff] (!%p313_p2)   ;;  %v5572_v25 = vld [vmem:[%s7106_s1 + $0x44] ss:$8 sps:$4 sm:$0xff] (!%p313_p2)   ;;  %v5574_v26 = vld [vmem:[%s7106_s1 + $0x40] ss:$8 sps:$4 sm:$0xff] (!%p313_p2)  }
   0x9   : > { %v5575_v27 = vld [vmem:[%s7106_s1 + $0x54] ss:$8 sps:$4 sm:$0xff] (!%p313_p2)   ;;  %v5577_v28 = vld [vmem:[%s7106_s1 + $0x50] ss:$8 sps:$4 sm:$0xff] (!%p313_p2)   ;;  %v5578_v29 = vld [vmem:[%s7106_s1 + $0x64] ss:$8 sps:$4 sm:$0xff] (!%p313_p2)  }
   0xa   : > { %v5580_v30 = vld [vmem:[%s7106_s1 + $0x60] ss:$8 sps:$4 sm:$0xff] (!%p313_p2)   ;;  %v5581_v31 = vld [vmem:[%s7106_s1 + $0x74] ss:$8 sps:$4 sm:$0xff] (!%p313_p2)   ;;  %v5583_v32 = vld [vmem:[%s7106_s1 + $0x70] ss:$8 sps:$4 sm:$0xff] (!%p313_p2)  }
   0xb   : > { %v5584_v33 = vld [vmem:[%s7106_s1 + $0x84] ss:$8 sps:$4 sm:$0xff] (!%p313_p2)   ;;  %v5586_v34 = vld [vmem:[%s7106_s1 + $0x80] ss:$8 sps:$4 sm:$0xff] (!%p313_p2)   ;;  %v5587_v35 = vld [vmem:[%s7106_s1 + $0x94] ss:$8 sps:$4 sm:$0xff] (!%p313_p2)  }
   0xc   : > { %v5589_v36 = vld [vmem:[%s7106_s1 + $0x90] ss:$8 sps:$4 sm:$0xff] (!%p313_p2)   ;;  %v5590_v37 = vld [vmem:[%s7106_s1 + $0xa4] ss:$8 sps:$4 sm:$0xff] (!%p313_p2)   ;;  %v5592_v38 = vld [vmem:[%s7106_s1 + $0xa0] ss:$8 sps:$4 sm:$0xff] (!%p313_p2)  }
   0xd   : > { %s7117_s14 = smov (!%p350_p3, %s4587_s14), 1  ;;  %v5593_v39 = vld [vmem:[%s7106_s1 + $0xb4] ss:$8 sps:$4 sm:$0xff]   ;;  %v5595_v40 = vld [vmem:[%s7106_s1 + $0xb0] ss:$8 sps:$4 sm:$0xff]   ;;  %v5645_v43 = vld [vmem:[%s7107_s2] sm:$0xff]  }
   0xe   : > { %s4959_s17 = sshll.u32 %s7117_s14, 7  ;;  %v5596_v41 = vld [vmem:[%s7106_s1 + $0xc4] ss:$8 sps:$4 sm:$0xff]   ;;  %v5598_v44 = vld [vmem:[%s7106_s1 + $0xc0] ss:$8 sps:$4 sm:$0xff]   ;;  %4962 = vmatpush3.bf16.msra.mxu1 %v5645_v43  ;;  %v5651_v48 = vld [vmem:[%s7107_s2 + $0x50] sm:$0xff]  }
   0xf   : > { %s5994_s20 = scalar_lea.vmem %s7105_s0, %s4959_s17  ;;  %v5646_v45 = vld [vmem:[%s7107_s2 + $0x48] sm:$0xff]   ;;  %v5599_v47 = vld [vmem:[%s7106_s1 + $0xd4] ss:$8 sps:$4 sm:$0xff]   ;;  %v5601_v50 = vld [vmem:[%s7106_s1 + $0xd0] ss:$8 sps:$4 sm:$0xff]   ;;  %vm2396_vm0 = vcmask 523264  }
  0x10   : > { %v5544_v2 = vld [vmem:[%s5994_s20] sm:$0xff]   ;;  %v5545_v3 = vld [vmem:[%s5994_s20 + $0x8] sm:$0xff]   ;;  %v5546_v4 = vld [vmem:[%s5994_s20 + $0x10] sm:$0xff]   ;;  %4963 = vmatprep.subr.bf16.mxu1 %v5646_v45  ;;  %vm5921_vm1 = vmmov 0   ;;  %vm3579_vm2 = vcmask 261120   ;;  %s4960_s25 = sshll.u32 %s7117_s14, 4 }
  0x11   : > { %922 = vmatpush1.bf16.msra.mxu0 %v5544_v2  ;;  %v5547_v5 = vld [vmem:[%s5994_s20 + $0x18] sm:$0xff]   ;;  %v5548_v6 = vld [vmem:[%s5994_s20 + $0x20] sm:$0xff]   ;;  %v5549_v7 = vld [vmem:[%s5994_s20 + $0x28] sm:$0xff]   ;;  %s359_s28 = scalar_lea.vmem %s7115_s10, %s4960_s25  ;;  %vm4529_vm3 = vcmask 31744  }
  0x12   : > { %923 = vmatprep.subr.bf16.mxu0 %v5919_v0  ;;  %v5550_v8 = vld [vmem:[%s5994_s20 + $0x30] sm:$0xff]   ;;  %v5551_v9 = vld [vmem:[%s5994_s20 + $0x38] sm:$0xff]   ;;  %v5552_v10 = vld [vmem:[%s5994_s20 + $0x40] sm:$0xff]  }
  0x13   : > { %v5553_v11 = vld [vmem:[%s5994_s20 + $0x48] sm:$0xff]   ;;  %v5554_v12 = vld [vmem:[%s5994_s20 + $0x50] sm:$0xff]   ;;  %v5555_v13 = vld [vmem:[%s5994_s20 + $0x58] sm:$0xff]  }
  0x14   : > { %v5556_v14 = vld [vmem:[%s5994_s20 + $0x60] sm:$0xff]   ;;  %v5557_v15 = vld [vmem:[%s5994_s20 + $0x68] sm:$0xff]   ;;  %v5558_v16 = vld [vmem:[%s5994_s20 + $0x70] sm:$0xff]  }
  0x15   : > { %924 = vmatpush1.bf16.msra.mxu0 %v5545_v3  ;;  %v5559_v17 = vld [vmem:[%s5994_s20 + $0x78] sm:$0xff]   ;;  %v5647_v46 = vld [vmem:[%s7107_s2 + $0x8] sm:$0xff]   ;;  %v5652_v49 = vld [vmem:[%s7107_s2 + $0x10] sm:$0xff]  }
  0x16   : > { %925 = vmatprep.subr.bf16.mxu0 %v5919_v0  ;;  %4964 = vmatpush3.bf16.msra.mxu1 %v5647_v46  ;;  %v5653_v51 = vld [vmem:[%s7107_s2 + $0x58] sm:$0xff]   ;;  %v5602_v53 = vld [vmem:[%s7106_s1 + $0xe4] ss:$8 sps:$4 sm:$0xff]   ;;  %v5604_v56 = vld [vmem:[%s7106_s1 + $0xe0] ss:$8 sps:$4 sm:$0xff]  }
  0x17   : > { %4965 = vmatprep.subr.bf16.mxu1 %v5651_v48  ;;  %v5654_v52 = vld [vmem:[%s7107_s2 + $0x18] sm:$0xff]   ;;  %v5658_v54 = vld [vmem:[%s7107_s2 + $0x60] sm:$0xff]   ;;  %v5660_v57 = vld [vmem:[%s7107_s2 + $0x68] sm:$0xff]  }
  0x18   : > { %v5659_v55 = vld [vmem:[%s7107_s2 + $0x20] sm:$0xff]   ;;  %v5661_v58 = vld [vmem:[%s7107_s2 + $0x28] sm:$0xff]   ;;  %v5605_v59 = vld [vmem:[%s7106_s1 + $0xf4] ss:$8 sps:$4 sm:$0xff]  }
  0x19   : > { %926 = vmatpush1.bf16.msra.mxu0 %v5546_v4  ;;  %v5665_v60 = vld [vmem:[%s7107_s2 + $0x70] sm:$0xff]   ;;  %v5667_v63 = vld [vmem:[%s7107_s2 + $0x78] sm:$0xff]   ;;  %v5608_v1 = vld [vmem:[%s7106_s1 + $0x104] ss:$8 sps:$4 sm:$0xff]  }
  0x1a   : > { %927 = vmatprep.subr.bf16.mxu0 %v5919_v0  ;;  %4966 = vmatpush3.bf16.msra.mxu1 %v5652_v49  ;;  %v5666_v61 = vld [vmem:[%s7107_s2 + $0x30] sm:$0xff]   ;;  %v5610_v2 = vld [vmem:[%s7106_s1 + $0x100] ss:$8 sps:$4 sm:$0xff]   ;;  %v5662_v43 = vld [vmem:[%s7106_s1 + $0x1e4] ss:$8 sps:$4 sm:$0xff]  }
  0x1b   : > { %4967 = vmatprep.subr.bf16.mxu1 %v5653_v51  ;;  %v5607_v62 = vld [vmem:[%s7106_s1 + $0xf0] ss:$8 sps:$4 sm:$0xff]   ;;  %v5611_v3 = vld [vmem:[%s7106_s1 + $0x114] ss:$8 sps:$4 sm:$0xff]   ;;  %v5664_v48 = vld [vmem:[%s7106_s1 + $0x1e0] ss:$8 sps:$4 sm:$0xff]  }
  0x1c   : > { %v5613_v4 = vld [vmem:[%s7106_s1 + $0x110] ss:$8 sps:$4 sm:$0xff]  }
  0x1d   : > { %928 = vmatpush1.bf16.msra.mxu0 %v5547_v5  ;;  %v5614_v5 = vld [vmem:[%s7106_s1 + $0x124] ss:$8 sps:$4 sm:$0xff]  }
  0x1e   : > { %929 = vmatprep.subr.bf16.mxu0 %v5919_v0  ;;  %4968 = vmatpush3.bf16.msra.mxu1 %v5654_v52 }
  0x1f   : > { %4969 = vmatprep.subr.bf16.mxu1 %v5658_v54 }
  0x21   : > { %930 = vmatpush1.bf16.msra.mxu0 %v5548_v6  ;;  %v5616_v6 = vld [vmem:[%s7106_s1 + $0x120] ss:$8 sps:$4 sm:$0xff]  }
  0x22   : > { %931 = vmatprep.subr.bf16.mxu0 %v5919_v0  ;;  %4970 = vmatpush3.bf16.msra.mxu1 %v5659_v55  ;;  %v5671_v55 = vld [vmem:[%s7106_s1 + $0x1f0] ss:$8 sps:$4 sm:$0xff]  }
  0x23   : > { %4971 = vmatprep.subr.bf16.mxu1 %v5660_v57  ;;  %v5672_v57 = vld [vmem:[%s7106_s1 + $0x204] ss:$8 sps:$4 sm:$0xff]  }
  0x25   : > { %932 = vmatpush1.bf16.msra.mxu0 %v5549_v7  ;;  %v5617_v7 = vld [vmem:[%s7106_s1 + $0x134] ss:$8 sps:$4 sm:$0xff]  }
  0x26   : > { %933 = vmatprep.subr.bf16.mxu0 %v5919_v0  ;;  %4972 = vmatpush3.bf16.msra.mxu1 %v5661_v58 }
  0x27   : > { %4973 = vmatprep.subr.bf16.mxu1 %v5665_v60  ;;  %v5685_v60 = vld [vmem:[%s7107_s2 + $0x80] sm:$0xff]  }
  0x29   : > { %934 = vmatpush1.bf16.msra.mxu0 %v5550_v8  ;;  %v5619_v8 = vld [vmem:[%s7106_s1 + $0x130] ss:$8 sps:$4 sm:$0xff]  }
  0x2a   : > { %935 = vmatprep.subr.bf16.mxu0 %v5919_v0  ;;  %4974 = vmatpush3.bf16.msra.mxu1 %v5666_v61  ;;  %v5686_v61 = vld [vmem:[%s7107_s2 + $0xc8] sm:$0xff]  }
  0x2b   : > { %4975 = vmatprep.subr.bf16.mxu1 %v5667_v63 }
  0x2d   : > { %936 = vmatpush1.bf16.msra.mxu0 %v5551_v9  ;;  %v5620_v9 = vld [vmem:[%s7106_s1 + $0x144] ss:$8 sps:$4 sm:$0xff]  }
  0x2e   : > { %937 = vmatprep.subr.bf16.mxu0 %v5919_v0 }
  0x31   : > { %938 = vmatpush1.bf16.msra.mxu0 %v5552_v10  ;;  %v5684_v10 = vld [vmem:[%s7107_s2 + $0xc0] sm:$0xff]  }
  0x32   : > { %939 = vmatprep.subr.bf16.mxu0 %v5919_v0 }
  0x35   : > { %940 = vmatpush1.bf16.msra.mxu0 %v5553_v11  ;;  %v5622_v11 = vld [vmem:[%s7106_s1 + $0x140] ss:$8 sps:$4 sm:$0xff]  }
  0x36   : > { %941 = vmatprep.subr.bf16.mxu0 %v5919_v0 }
  0x39   : > { %942 = vmatpush1.bf16.msra.mxu0 %v5554_v12  ;;  %v5623_v12 = vld [vmem:[%s7106_s1 + $0x154] ss:$8 sps:$4 sm:$0xff]  }
  0x3a   : > { %943 = vmatprep.subr.bf16.mxu0 %v5919_v0 }
  0x3d   : > { %944 = vmatpush1.bf16.msra.mxu0 %v5555_v13  ;;  %v5625_v13 = vld [vmem:[%s7106_s1 + $0x150] ss:$8 sps:$4 sm:$0xff]  }
  0x3e   : > { %945 = vmatprep.subr.bf16.mxu0 %v5919_v0 }
  0x41   : > { %946 = vmatpush1.bf16.msra.mxu0 %v5556_v14  ;;  %v5626_v14 = vld [vmem:[%s7106_s1 + $0x164] ss:$8 sps:$4 sm:$0xff]  }
  0x42   : > { %947 = vmatprep.subr.bf16.mxu0 %v5919_v0 }
  0x45   : > { %948 = vmatpush1.bf16.msra.mxu0 %v5557_v15  ;;  %v5628_v15 = vld [vmem:[%s7106_s1 + $0x160] ss:$8 sps:$4 sm:$0xff]  }
  0x46   : > { %949 = vmatprep.subr.bf16.mxu0 %v5919_v0 }
  0x49   : > { %950 = vmatpush1.bf16.msra.mxu0 %v5558_v16  ;;  %v5629_v16 = vld [vmem:[%s7106_s1 + $0x174] ss:$8 sps:$4 sm:$0xff]  }
  0x4a   : > { %951 = vmatprep.subr.bf16.mxu0 %v5919_v0  ;;  %v5668_v0 = vld [vmem:[%s7107_s2 + $0x38] sm:$0xff]  }
  0x4b   : > { %4976 = vmatpush3.bf16.msra.mxu1 %v5668_v0  ;;  %v5688_v0 = vld [vmem:[%s7107_s2 + $0xd0] sm:$0xff]  }
  0x4c   : > { %5001 = vmatprep.subr.bf16.mxu1 %v5684_v10 }
  0x4d   : > { %952 = vmatpush1.bf16.msra.mxu0 %v5559_v17  ;;  %v5631_v17 = vld [vmem:[%s7106_s1 + $0x170] ss:$8 sps:$4 sm:$0xff]  }
  0x50   : > { %954 = vmatmul.mubr.bf16.vlgmr.msra.gmra.mrb[0].mxu0 %v5560_v18  ;;  %v5632_v18 = vld [vmem:[%s7106_s1 + $0x184] ss:$8 sps:$4 sm:$0xff]  }
  0x51   : > { %961 = vmatprep.mubr.bf16.mxu0 %v5563_v19  ;;  %v5634_v19 = vld [vmem:[%s7106_s1 + $0x180] ss:$8 sps:$4 sm:$0xff]  }
  0x58   : > { %962 = vmatmul.mubr.bf16.gmra.mrb[4].mxu0 %v5565_v20  ;;  %v5635_v20 = vld [vmem:[%s7106_s1 + $0x194] ss:$8 sps:$4 sm:$0xff]  }
  0x59   : > { %969 = vmatprep.mubr.bf16.mxu0 %v5566_v21  ;;  %v5637_v21 = vld [vmem:[%s7106_s1 + $0x190] ss:$8 sps:$4 sm:$0xff]  }
  0x60   : > { %970 = vmatmul.mubr.bf16.gmra.mrb[8].mxu0 %v5568_v22  ;;  %v5638_v22 = vld [vmem:[%s7106_s1 + $0x1a4] ss:$8 sps:$4 sm:$0xff]  }
  0x61   : > { %977 = vmatprep.mubr.bf16.mxu0 %v5569_v23  ;;  %v5640_v23 = vld [vmem:[%s7106_s1 + $0x1a0] ss:$8 sps:$4 sm:$0xff]  }
  0x68   : > { %978 = vmatmul.mubr.bf16.gmra.mrb[12].mxu0 %v5571_v24  ;;  %v5641_v24 = vld [vmem:[%s7106_s1 + $0x1b4] ss:$8 sps:$4 sm:$0xff]  }
  0x69   : > { %985 = vmatprep.mubr.bf16.mxu0 %v5572_v25 }
  0x70   : > { %986 = vmatmul.mubr.bf16.gmra.mrb[16].mxu0 %v5574_v26 }
  0x71   : > { %993 = vmatprep.mubr.bf16.mxu0 %v5575_v27  ;;  %v5643_v27 = vld [vmem:[%s7106_s1 + $0x1b0] ss:$8 sps:$4 sm:$0xff]  }
  0x78   : > { %994 = vmatmul.mubr.bf16.gmra.mrb[20].mxu0 %v5577_v28 }
  0x79   : > { %1001 = vmatprep.mubr.bf16.mxu0 %v5578_v29  ;;  %v5648_v29 = vld [vmem:[%s7106_s1 + $0x1c4] ss:$8 sps:$4 sm:$0xff]  }
  0x80   : > { %1002 = vmatmul.mubr.bf16.gmra.mrb[24].mxu0 %v5580_v30 }
  0x81   : > { %1009 = vmatprep.mubr.bf16.mxu0 %v5581_v31 }
  0x88   : > { %1010 = vmatmul.mubr.bf16.gmra.mrb[28].mxu0 %v5583_v32 }
  0x89   : > { %1017 = vmatprep.mubr.bf16.mxu0 %v5584_v33 }
  0x90   : > { %1018 = vmatmul.mubr.bf16.gmra.mrb[32].mxu0 %v5586_v34  ;;  %v5650_v34 = vld [vmem:[%s7106_s1 + $0x1c0] ss:$8 sps:$4 sm:$0xff]  }
  0x91   : > { %1025 = vmatprep.mubr.bf16.mxu0 %v5587_v35 }
  0x98   : > { %1026 = vmatmul.mubr.bf16.gmra.mrb[36].mxu0 %v5589_v36  ;;  %v5655_v36 = vld [vmem:[%s7106_s1 + $0x1d4] ss:$8 sps:$4 sm:$0xff]  }
  0x99   : > { %1033 = vmatprep.mubr.bf16.mxu0 %v5590_v37 }
  0xa0   : > { %1034 = vmatmul.mubr.bf16.gmra.mrb[40].mxu0 %v5592_v38 }
  0xa1   : > { %1041 = vmatprep.mubr.bf16.mxu0 %v5593_v39 }
  0xa8   : > { %1042 = vmatmul.mubr.bf16.gmra.mrb[44].mxu0 %v5595_v40 }
  0xa9   : > { %1049 = vmatprep.mubr.bf16.mxu0 %v5596_v41  ;;  %v5657_v41 = vld [vmem:[%s7106_s1 + $0x1d0] ss:$8 sps:$4 sm:$0xff]  }
  0xb0   : > { %1050 = vmatmul.mubr.bf16.gmra.mrb[48].mxu0 %v5598_v44 }
  0xb1   : > { %1057 = vmatprep.mubr.bf16.mxu0 %v5599_v47 }
  0xb8   : > { %1058 = vmatmul.mubr.bf16.gmra.mrb[52].mxu0 %v5601_v50  ;;  %v5669_v50 = vld [vmem:[%s7106_s1 + $0x1f4] ss:$8 sps:$4 sm:$0xff]  }
  0xb9   : > { %1065 = vmatprep.mubr.bf16.mxu0 %v5602_v53 }
  0xc0   : > { %1066 = vmatmul.mubr.bf16.gmra.mrb[56].mxu0 %v5604_v56 }
  0xc1   : > { %1073 = vmatprep.mubr.bf16.mxu0 %v5605_v59 }
  0xc8   : > { %1074 = vmatmul.mubr.bf16.gmra.mrb[60].mxu0 %v5607_v62  ;;  %v5687_v62 = vld [vmem:[%s7107_s2 + $0x88] sm:$0xff]  }
  0xc9   : > { %1081 = vmatprep.mubr.bf16.mxu0 %v5608_v1 }
  0xd0   : > { %1082 = vmatmul.mubr.bf16.gmra.mrb[64].mxu0 %v5610_v2  ;;  %v5674_v2 = vld [vmem:[%s7106_s1 + $0x200] ss:$8 sps:$4 sm:$0xff]  }
  0xd1   : > { %1089 = vmatprep.mubr.bf16.mxu0 %v5611_v3 }
  0xd8   : > { %1090 = vmatmul.mubr.bf16.gmra.mrb[68].mxu0 %v5613_v4  ;;  %v5675_v4 = vld [vmem:[%s7106_s1 + $0x214] ss:$8 sps:$4 sm:$0xff]  }
  0xd9   : > { %1097 = vmatprep.mubr.bf16.mxu0 %v5614_v5 }
  0xe0   : > { %1098 = vmatmul.mubr.bf16.gmra.mrb[72].mxu0 %v5616_v6 }
  0xe1   : > { %1105 = vmatprep.mubr.bf16.mxu0 %v5617_v7  ;;  %v5689_v7 = vld [vmem:[%s7107_s2 + $0x90] sm:$0xff]  }
  0xe8   : > { %1106 = vmatmul.mubr.bf16.gmra.mrb[76].mxu0 %v5619_v8  ;;  %v5690_v8 = vld [vmem:[%s7107_s2 + $0xd8] sm:$0xff]  }
  0xe9   : > { %1113 = vmatprep.mubr.bf16.mxu0 %v5620_v9  ;;  %v5691_v9 = vld [vmem:[%s7107_s2 + $0x98] sm:$0xff]  }
  0xf0   : > { %1114 = vmatmul.mubr.bf16.gmra.mrb[80].mxu0 %v5622_v11  ;;  %v5692_v11 = vld [vmem:[%s7107_s2 + $0xe0] sm:$0xff]  }
  0xf1   : > { %1121 = vmatprep.mubr.bf16.mxu0 %v5623_v12 }
  0xf8   : > { %1122 = vmatmul.mubr.bf16.gmra.mrb[84].mxu0 %v5625_v13  ;;  %v5677_v13 = vld [vmem:[%s7106_s1 + $0x210] ss:$8 sps:$4 sm:$0xff]  }
  0xf9   : > { %1129 = vmatprep.mubr.bf16.mxu0 %v5626_v14 }
 0x100   : > { %1130 = vmatmul.mubr.bf16.gmra.mrb[88].mxu0 %v5628_v15  ;;  %v5678_v15 = vld [vmem:[%s7106_s1 + $0x224] ss:$8 sps:$4 sm:$0xff]  }
 0x101   : > { %1137 = vmatprep.mubr.bf16.mxu0 %v5629_v16 }
 0x108   : > { %1138 = vmatmul.mubr.bf16.gmra.mrb[92].mxu0 %v5631_v17 }
 0x109   : > { %1145 = vmatprep.mubr.bf16.mxu0 %v5632_v18  ;;  %v5693_v18 = vld [vmem:[%s7107_s2 + $0xa0] sm:$0xff]  }
 0x110   : > { %1146 = vmatmul.mubr.bf16.gmra.mrb[96].mxu0 %v5634_v19  ;;  %v5694_v19 = vld [vmem:[%s7107_s2 + $0xe8] sm:$0xff]  }
 0x111   : > { %1153 = vmatprep.mubr.bf16.mxu0 %v5635_v20  ;;  %v5695_v20 = vld [vmem:[%s7107_s2 + $0xa8] sm:$0xff]  }
 0x118   : > { %1154 = vmatmul.mubr.bf16.gmra.mrb[100].mxu0 %v5637_v21 }
 0x119   : > { %1161 = vmatprep.mubr.bf16.mxu0 %v5638_v22  ;;  %v5696_v22 = vld [vmem:[%s7107_s2 + $0xf0] sm:$0xff]  }
 0x120   : > { %1162 = vmatmul.mubr.bf16.gmra.mrb[104].mxu0 %v5640_v23 }
 0x121   : > { %1169 = vmatprep.mubr.bf16.mxu0 %v5641_v24  ;;  %v5680_v24 = vld [vmem:[%s7106_s1 + $0x220] ss:$8 sps:$4 sm:$0xff]  }
 0x123   : > { %v955_v25 = vpop.f32.mrb[0].mxu0 }
 0x124   : > { %v957_v26 = vpop.f32.mrb[1].mxu0 }
 0x125   : > { %v958_v28 = vpop.f32.mrb[2].mxu0  ;;  %v5681_v26 = vld [vmem:[%s7106_s1 + $0x234] ss:$8 sps:$4 sm:$0xff]  }
 0x126   : > { %v1242_v30 = vpack.c.bf16 %v958_v28, %v955_v25  ;;  %v960_v31 = vpop.f32.mrb[3].mxu0 }
 0x127   : > { %v5699_v31 = vld [vmem:[%s7107_s2 + $0xb8] sm:$0xff]  }
 0x128   : > { %1170 = vmatmul.mubr.bf16.gmra.mrb[108].mxu0 %v5643_v27 }
 0x129   : > { %1177 = vmatprep.mubr.bf16.mxu0 %v5648_v29  ;;  %v5697_v29 = vld [vmem:[%s7107_s2 + $0xb0] sm:$0xff]  }
 0x12b   : > { %v963_v32 = vpop.f32.mrb[4].mxu0 }
 0x12c   : > { %v965_v33 = vpop.f32.mrb[5].mxu0 }
 0x12d   : > { %v966_v35 = vpop.f32.mrb[6].mxu0  ;;  %v5700_v33 = vld [vmem:[%s7107_s2 + $0x140] sm:$0xff]  }
 0x12e   : > { %v1243_v37 = vpack.c.bf16 %v966_v35, %v963_v32  ;;  %v968_v38 = vpop.f32.mrb[7].mxu0  ;;  %v5683_v35 = vld [vmem:[%s7106_s1 + $0x230] ss:$8 sps:$4 sm:$0xff]  }
 0x130   : > { %1178 = vmatmul.mubr.bf16.gmra.mrb[112].mxu0 %v5650_v34 }
 0x131   : > { %1185 = vmatprep.mubr.bf16.mxu0 %v5655_v36 }
 0x133   : > { %v6237_v39 = vpop.f32.mrb[8].mxu0 }
 0x134   : > { %v973_v40 = vpop.f32.mrb[9].mxu0 }
 0x135   : > { %v6242_v42 = vpop.f32.mrb[10].mxu0 }
 0x136   : > { %v1244_v44 = vpack.c.bf16 %v6242_v42, %v6237_v39  ;;  %v976_v45 = vpop.f32.mrb[11].mxu0 }
 0x138   : > { %1186 = vmatmul.mubr.bf16.gmra.mrb[116].mxu0 %v5657_v41 }
 0x139   : > { %1193 = vmatprep.mubr.bf16.mxu0 %v5662_v43 }
 0x13b   : > { %v6249_v46 = vpop.f32.mrb[12].mxu0 }
 0x13c   : > { %v981_v47 = vpop.f32.mrb[13].mxu0 }
 0x13d   : > { %v6254_v49 = vpop.f32.mrb[14].mxu0 }
 0x13e   : > { %v1245_v51 = vpack.c.bf16 %v6254_v49, %v6249_v46  ;;  %v984_v52 = vpop.f32.mrb[15].mxu0 }
 0x140   : > { %1194 = vmatmul.mubr.bf16.gmra.mrb[120].mxu0 %v5664_v48 }
 0x141   : > { %1201 = vmatprep.mubr.bf16.mxu0 %v5669_v50 }
 0x143   : > { %v987_v53 = vpop.f32.mrb[16].mxu0 }
 0x144   : > { %v989_v54 = vpop.f32.mrb[17].mxu0 }
 0x145   : > { %v990_v56 = vpop.f32.mrb[18].mxu0 }
 0x146   : > { %v992_v58 = vpop.f32.mrb[19].mxu0  ;;  %v1246_v59 = vpack.c.bf16 %v990_v56, %v987_v53 }
 0x148   : > { %1202 = vmatmul.mubr.bf16.gmra.mrb[124].mxu0 %v5671_v55  ;;  %1965 = vmatprep.mubr.bf16.mxu1 %v1246_v59  ;;  %v5701_v59 = vld [vmem:[%s7107_s2 + $0x100] sm:$0xff]  }
 0x149   : > { %1966 = vmatmul.mubr.bf16.vlgmr.msra.gmra.mrb[0].mxu1 %v1242_v30  ;;  %1209 = vmatprep.mubr.bf16.mxu0 %v5672_v57  ;;  %v5698_v30 = vld [vmem:[%s7107_s2 + $0xf8] sm:$0xff]  }
 0x14a   : > { %5002 = vmatpush3.bf16.msra.mxu1 %v5685_v60  ;;  %v5702_v60 = vld [vmem:[%s7107_s2 + $0x148] sm:$0xff]  }
 0x14b   : > { %v995_v63 = vpop.f32.mrb[20].mxu0  ;;  %5003 = vmatprep.subr.bf16.mxu1 %v5686_v61  ;;  %v5703_v61 = vld [vmem:[%s7107_s2 + $0x108] sm:$0xff]  }
 0x14c   : > { %v997_v1 = vpop.f32.mrb[21].mxu0 }
 0x14d   : > { %v998_v3 = vpop.f32.mrb[22].mxu0 }
 0x14e   : > { %v1247_v5 = vpack.c.bf16 %v998_v3, %v995_v63  ;;  %v1000_v6 = vpop.f32.mrb[23].mxu0  ;;  %5004 = vmatpush3.bf16.msra.mxu1 %v5687_v62  ;;  %v5704_v63 = vld [vmem:[%s7107_s2 + $0x150] sm:$0xff]  }
 0x14f   : > { %5005 = vmatprep.subr.bf16.mxu1 %v5688_v0  ;;  %v5707_v6 = vld [vmem:[%s7107_s2 + $0x118] sm:$0xff]  }
 0x150   : > { %1210 = vmatmul.mubr.bf16.gmra.mrb[128].mxu0 %v5674_v2  ;;  %1973 = vmatprep.mubr.bf16.mxu1 %v1247_v5  ;;  %v5706_v5 = vld [vmem:[%s7107_s2 + $0x158] sm:$0xff]  }
 0x151   : > { %1974 = vmatmul.mubr.bf16.gmra.mrb[4].mxu1 %v1243_v37  ;;  %1217 = vmatprep.mubr.bf16.mxu0 %v5675_v4  ;;  %v5705_v4 = vld [vmem:[%s7107_s2 + $0x110] sm:$0xff]  }
 0x152   : > { %5006 = vmatpush3.bf16.msra.mxu1 %v5689_v7 }
 0x153   : > { %v1003_v10 = vpop.f32.mrb[24].mxu0  ;;  %5007 = vmatprep.subr.bf16.mxu1 %v5690_v8  ;;  %v5708_v8 = vld [vmem:[%s7107_s2 + $0x160] sm:$0xff]  }
 0x154   : > { %v1005_v12 = vpop.f32.mrb[25].mxu0 }
 0x155   : > { %v1006_v14 = vpop.f32.mrb[26].mxu0 }
 0x156   : > { %v1248_v16 = vpack.c.bf16 %v1006_v14, %v1003_v10  ;;  %v1008_v17 = vpop.f32.mrb[27].mxu0  ;;  %5008 = vmatpush3.bf16.msra.mxu1 %v5691_v9  ;;  %v5710_v14 = vld [vmem:[%s7107_s2 + $0x168] sm:$0xff]  }
 0x157   : > { %5009 = vmatprep.subr.bf16.mxu1 %v5692_v11  ;;  %v5712_v17 = vld [vmem:[%s7107_s2 + $0x170] sm:$0xff]  }
 0x158   : > { %1218 = vmatmul.mubr.bf16.gmra.mrb[132].mxu0 %v5677_v13  ;;  %1981 = vmatprep.mubr.bf16.mxu1 %v1248_v16  ;;  %v5709_v13 = vld [vmem:[%s7107_s2 + $0x120] sm:$0xff]  }
 0x159   : > { %1982 = vmatmul.mubr.bf16.gmra.mrb[8].mxu1 %v1244_v44  ;;  %1225 = vmatprep.mubr.bf16.mxu0 %v5678_v15  ;;  %v5711_v15 = vld [vmem:[%s7107_s2 + $0x128] sm:$0xff]  }
 0x15a   : > { %5010 = vmatpush3.bf16.msra.mxu1 %v5693_v18 }
 0x15b   : > { %v1011_v21 = vpop.f32.mrb[28].mxu0  ;;  %5011 = vmatprep.subr.bf16.mxu1 %v5694_v19 }
 0x15c   : > { %v1013_v23 = vpop.f32.mrb[29].mxu0 }
 0x15d   : > { %v1014_v25 = vpop.f32.mrb[30].mxu0  ;;  %v5714_v23 = vld [vmem:[%s7107_s2 + $0x178] sm:$0xff]  }
 0x15e   : > { %v1249_v27 = vpack.c.bf16 %v1014_v25, %v1011_v21  ;;  %v1016_v28 = vpop.f32.mrb[31].mxu0  ;;  %5012 = vmatpush3.bf16.msra.mxu1 %v5695_v20 }
 0x15f   : > { %5013 = vmatprep.subr.bf16.mxu1 %v5696_v22  ;;  %v5713_v22 = vld [vmem:[%s7107_s2 + $0x130] sm:$0xff]  }
 0x160   : > { %1226 = vmatmul.mubr.bf16.gmra.mrb[136].mxu0 %v5680_v24  ;;  %1989 = vmatprep.mubr.bf16.mxu1 %v1249_v27  ;;  %v5715_v24 = vld [vmem:[%s7107_s2 + $0x138] sm:$0xff]  }
 0x161   : > { %1990 = vmatmul.mubr.bf16.gmra.mrb[12].mxu1 %v1245_v51  ;;  %1233 = vmatprep.mubr.bf16.mxu0 %v5681_v26  ;;  %v5716_v26 = vld [vmem:[%s7107_s2 + $0x1c0] sm:$0xff]  }
 0x162   : > { %5014 = vmatpush3.bf16.msra.mxu1 %v5697_v29 }
 0x163   : > { %v1019_v32 = vpop.f32.mrb[32].mxu0  ;;  %5015 = vmatprep.subr.bf16.mxu1 %v5698_v30 }
 0x164   : > { %v1021_v34 = vpop.f32.mrb[33].mxu0 }
 0x165   : > { %v1022_v36 = vpop.f32.mrb[34].mxu0 }
 0x166   : > { %v1250_v37 = vpack.c.bf16 %v1022_v36, %v1019_v32  ;;  %v1024_v38 = vpop.f32.mrb[35].mxu0  ;;  %5016 = vmatpush3.bf16.msra.mxu1 %v5699_v31 }
 0x167   : > { %5041 = vmatprep.subr.bf16.mxu1 %v5700_v33 }
 0x168   : > { %1234 = vmatmul.mubr.bf16.gmra.mrb[140].mxu0 %v5683_v35 }
 0x16b   : > { %v1027_v39 = vpop.f32.mrb[36].mxu0 }
 0x16c   : > { %v1029_v40 = vpop.f32.mrb[37].mxu0 }
 0x16d   : > { %v1030_v41 = vpop.f32.mrb[38].mxu0 }
 0x16e   : > { %v1251_v42 = vpack.c.bf16 %v1030_v41, %v1027_v39  ;;  %v1032_v43 = vpop.f32.mrb[39].mxu0 }
 0x173   : > { %v1035_v44 = vpop.f32.mrb[40].mxu0 }
 0x174   : > { %v1037_v45 = vpop.f32.mrb[41].mxu0 }
 0x175   : > { %v1038_v46 = vpop.f32.mrb[42].mxu0 }
 0x176   : > { %v1252_v47 = vpack.c.bf16 %v1038_v46, %v1035_v44  ;;  %v1040_v48 = vpop.f32.mrb[43].mxu0 }
 0x17b   : > { %v1043_v49 = vpop.f32.mrb[44].mxu0 }
 0x17c   : > { %v1045_v50 = vpop.f32.mrb[45].mxu0 }
 0x17d   : > { %v1046_v51 = vpop.f32.mrb[46].mxu0 }
 0x17e   : > { %v1253_v52 = vpack.c.bf16 %v1046_v51, %v1043_v49  ;;  %v1048_v53 = vpop.f32.mrb[47].mxu0  ;;  %v5717_v51 = vld [vmem:[%s7107_s2 + $0x180] sm:$0xff]  }
 0x17f   : > { %v5719_v53 = vld [vmem:[%s7107_s2 + $0x188] sm:$0xff]  }
 0x183   : > { %v1051_v54 = vpop.f32.mrb[48].mxu0 }
 0x184   : > { %v1053_v55 = vpop.f32.mrb[49].mxu0 }
 0x185   : > { %v1054_v56 = vpop.f32.mrb[50].mxu0  ;;  %v5720_v55 = vld [vmem:[%s7107_s2 + $0x1d0] sm:$0xff]  }
 0x186   : > { %v1254_v57 = vpack.c.bf16 %v1054_v56, %v1051_v54  ;;  %v1056_v58 = vpop.f32.mrb[51].mxu0 }
 0x188   : > { %2030 = vmatprep.mubr.bf16.mxu1 %v1254_v57 }
 0x189   : > { %2031 = vmatmul.mubr.bf16.vlgmr.msra.gmra.mrb[16].mxu1 %v1250_v37 }
 0x18a   : > { %5042 = vmatpush3.bf16.msra.mxu1 %v5701_v59 }
 0x18b   : > { %v1059_v62 = vpop.f32.mrb[52].mxu0  ;;  %5043 = vmatprep.subr.bf16.mxu1 %v5702_v60  ;;  %v5721_v60 = vld [vmem:[%s7107_s2 + $0x190] sm:$0xff]  }
 0x18c   : > { %v1061_v0 = vpop.f32.mrb[53].mxu0 }
 0x18d   : > { %v1062_v1 = vpop.f32.mrb[54].mxu0  ;;  %v5724_v0 = vld [vmem:[%s7107_s2 + $0x1e0] sm:$0xff]  }
 0x18e   : > { %v1255_v2 = vpack.c.bf16 %v1062_v1, %v1059_v62  ;;  %v1064_v3 = vpop.f32.mrb[55].mxu0  ;;  %5044 = vmatpush3.bf16.msra.mxu1 %v5703_v61  ;;  %v5722_v61 = vld [vmem:[%s7107_s2 + $0x1d8] sm:$0xff]  }
 0x18f   : > { %5045 = vmatprep.subr.bf16.mxu1 %v5704_v63  ;;  %v5723_v62 = vld [vmem:[%s7107_s2 + $0x198] sm:$0xff]  }
 0x190   : > { %2038 = vmatprep.mubr.bf16.mxu1 %v1255_v2 }
 0x191   : > { %2039 = vmatmul.mubr.bf16.gmra.mrb[20].mxu1 %v1251_v42 }
 0x192   : > { %5046 = vmatpush3.bf16.msra.mxu1 %v5705_v4 }
 0x193   : > { %v1067_v7 = vpop.f32.mrb[56].mxu0  ;;  %5047 = vmatprep.subr.bf16.mxu1 %v5706_v5  ;;  %v5725_v5 = vld [vmem:[%s7107_s2 + $0x1a0] sm:$0xff]  }
 0x194   : > { %v1069_v9 = vpop.f32.mrb[57].mxu0 }
 0x195   : > { %v1070_v10 = vpop.f32.mrb[58].mxu0  ;;  %v5728_v9 = vld [vmem:[%s7107_s2 + $0x1f0] sm:$0xff]  }
 0x196   : > { %v1256_v11 = vpack.c.bf16 %v1070_v10, %v1067_v7  ;;  %v1072_v12 = vpop.f32.mrb[59].mxu0  ;;  %5048 = vmatpush3.bf16.msra.mxu1 %v5707_v6  ;;  %v5726_v6 = vld [vmem:[%s7107_s2 + $0x1e8] sm:$0xff]  }
 0x197   : > { %5049 = vmatprep.subr.bf16.mxu1 %v5708_v8  ;;  %v5727_v7 = vld [vmem:[%s7107_s2 + $0x1a8] sm:$0xff]  }
 0x198   : > { %2046 = vmatprep.mubr.bf16.mxu1 %v1256_v11 }
 0x199   : > { %2047 = vmatmul.mubr.bf16.gmra.mrb[24].mxu1 %v1252_v47 }
 0x19a   : > { %5050 = vmatpush3.bf16.msra.mxu1 %v5709_v13 }
 0x19b   : > { %v1075_v16 = vpop.f32.mrb[60].mxu0  ;;  %5051 = vmatprep.subr.bf16.mxu1 %v5710_v14  ;;  %v5729_v14 = vld [vmem:[%s7107_s2 + $0x1b0] sm:$0xff]  }
 0x19c   : > { %v1077_v18 = vpop.f32.mrb[61].mxu0 }
 0x19d   : > { %v1078_v19 = vpop.f32.mrb[62].mxu0  ;;  %v5732_v18 = vld [vmem:[%s7107_s2 + $0x200] sm:$0xff]  }
 0x19e   : > { %v1257_v20 = vpack.c.bf16 %v1078_v19, %v1075_v16  ;;  %v1080_v21 = vpop.f32.mrb[63].mxu0  ;;  %5052 = vmatpush3.bf16.msra.mxu1 %v5711_v15  ;;  %v5730_v15 = vld [vmem:[%s7107_s2 + $0x1f8] sm:$0xff]  }
 0x19f   : > { %5053 = vmatprep.subr.bf16.mxu1 %v5712_v17  ;;  %v5731_v16 = vld [vmem:[%s7107_s2 + $0x1b8] sm:$0xff]  }
 0x1a0   : > { %2054 = vmatprep.mubr.bf16.mxu1 %v1257_v20 }
 0x1a1   : > { %2055 = vmatmul.mubr.bf16.gmra.mrb[28].mxu1 %v1253_v52  ;;  %v5718_v52 = vld [vmem:[%s7107_s2 + $0x1c8] sm:$0xff]  }
 0x1a2   : > { %5054 = vmatpush3.bf16.msra.mxu1 %v5713_v22 }
 0x1a3   : > { %v1083_v25 = vpop.f32.mrb[64].mxu0  ;;  %5055 = vmatprep.subr.bf16.mxu1 %v5714_v23 }
 0x1a4   : > { %v1085_v27 = vpop.f32.mrb[65].mxu0 }
 0x1a5   : > { %v1086_v28 = vpop.f32.mrb[66].mxu0 }
 0x1a6   : > { %v1258_v29 = vpack.c.bf16 %v1086_v28, %v1083_v25  ;;  %v1088_v30 = vpop.f32.mrb[67].mxu0  ;;  %5056 = vmatpush3.bf16.msra.mxu1 %v5715_v24 }
 0x1a7   : > { %5081 = vmatprep.subr.bf16.mxu1 %v5716_v26 }
 0x1ab   : > { %v1091_v31 = vpop.f32.mrb[68].mxu0 }
 0x1ac   : > { %v1093_v32 = vpop.f32.mrb[69].mxu0 }
 0x1ad   : > { %v1094_v33 = vpop.f32.mrb[70].mxu0 }
 0x1ae   : > { %v1259_v34 = vpack.c.bf16 %v1094_v33, %v1091_v31  ;;  %v1096_v35 = vpop.f32.mrb[71].mxu0 }
 0x1b3   : > { %v1099_v36 = vpop.f32.mrb[72].mxu0 }
 0x1b4   : > { %v1101_v37 = vpop.f32.mrb[73].mxu0 }
 0x1b5   : > { %v1102_v38 = vpop.f32.mrb[74].mxu0 }
 0x1b6   : > { %v1260_v39 = vpack.c.bf16 %v1102_v38, %v1099_v36  ;;  %v1104_v40 = vpop.f32.mrb[75].mxu0 }
 0x1bb   : > { %v1107_v41 = vpop.f32.mrb[76].mxu0 }
 0x1bc   : > { %v1109_v42 = vpop.f32.mrb[77].mxu0 }
 0x1bd   : > { %v1110_v43 = vpop.f32.mrb[78].mxu0 }
 0x1be   : > { %v1261_v44 = vpack.c.bf16 %v1110_v43, %v1107_v41  ;;  %v1112_v45 = vpop.f32.mrb[79].mxu0  ;;  %v5733_v43 = vld [vmem:[%s7107_s2 + $0x208] sm:$0xff]  }
 0x1bf   : > { %v5734_v45 = vld [vmem:[%s7107_s2 + $0x210] sm:$0xff]  }
 0x1c3   : > { %v1115_v46 = vpop.f32.mrb[80].mxu0 }
 0x1c4   : > { %v1117_v47 = vpop.f32.mrb[81].mxu0 }
 0x1c5   : > { %v1118_v48 = vpop.f32.mrb[82].mxu0 }
 0x1c6   : > { %v1262_v49 = vpack.c.bf16 %v1118_v48, %v1115_v46  ;;  %v1120_v50 = vpop.f32.mrb[83].mxu0 }
 0x1c7   : > { %v5735_v50 = vld [vmem:[%s7107_s2 + $0x218] sm:$0xff]  }
 0x1c8   : > { %2095 = vmatprep.mubr.bf16.mxu1 %v1262_v49 }
 0x1c9   : > { %2096 = vmatmul.mubr.bf16.vlgmr.msra.gmra.mrb[32].mxu1 %v1258_v29 }
 0x1ca   : > { %5082 = vmatpush3.bf16.msra.mxu1 %v5717_v51 }
 0x1cb   : > { %v1123_v54 = vpop.f32.mrb[84].mxu0  ;;  %5083 = vmatprep.subr.bf16.mxu1 %v5718_v52  ;;  %v5736_v52 = vld [vmem:[%s7107_s2 + $0x220] sm:$0xff]  }
 0x1cc   : > { %v1125_v56 = vpop.f32.mrb[85].mxu0 }
 0x1cd   : > { %v1126_v57 = vpop.f32.mrb[86].mxu0 }
 0x1ce   : > { %v1263_v58 = vpack.c.bf16 %v1126_v57, %v1123_v54  ;;  %v1128_v59 = vpop.f32.mrb[87].mxu0  ;;  %5084 = vmatpush3.bf16.msra.mxu1 %v5719_v53  ;;  %v5737_v57 = vld [vmem:[%s7107_s2 + $0x228] sm:$0xff]  }
 0x1cf   : > { %5085 = vmatprep.subr.bf16.mxu1 %v5720_v55  ;;  %v5738_v59 = vld [vmem:[%s7107_s2 + $0x230] sm:$0xff]  }
 0x1d0   : > { %2103 = vmatprep.mubr.bf16.mxu1 %v1263_v58 }
 0x1d1   : > { %2104 = vmatmul.mubr.bf16.gmra.mrb[36].mxu1 %v1259_v34 }
 0x1d2   : > { %5086 = vmatpush3.bf16.msra.mxu1 %v5721_v60 }
 0x1d3   : > { %v1131_v63 = vpop.f32.mrb[88].mxu0  ;;  %5087 = vmatprep.subr.bf16.mxu1 %v5722_v61 }
 0x1d4   : > { %v1133_v1 = vpop.f32.mrb[89].mxu0 }
 0x1d5   : > { %v1134_v2 = vpop.f32.mrb[90].mxu0 }
 0x1d6   : > { %v1264_v3 = vpack.c.bf16 %v1134_v2, %v1131_v63  ;;  %v1136_v4 = vpop.f32.mrb[91].mxu0  ;;  %5088 = vmatpush3.bf16.msra.mxu1 %v5723_v62 }
 0x1d7   : > { %5089 = vmatprep.subr.bf16.mxu1 %v5724_v0 }
 0x1d8   : > { %2111 = vmatprep.mubr.bf16.mxu1 %v1264_v3 }
 0x1d9   : > { %2112 = vmatmul.mubr.bf16.gmra.mrb[40].mxu1 %v1260_v39 }
 0x1da   : > { %5090 = vmatpush3.bf16.msra.mxu1 %v5725_v5  ;;  %v5739_v5 = vld [vmem:[%s7107_s2 + $0x238] sm:$0xff]  }
 0x1db   : > { %v1139_v8 = vpop.f32.mrb[92].mxu0  ;;  %5091 = vmatprep.subr.bf16.mxu1 %v5726_v6 }
 0x1dc   : > { %v1141_v10 = vpop.f32.mrb[93].mxu0 }
 0x1dd   : > { %v1142_v11 = vpop.f32.mrb[94].mxu0 }
 0x1de   : > { %v1265_v12 = vpack.c.bf16 %v1142_v11, %v1139_v8  ;;  %v1144_v13 = vpop.f32.mrb[95].mxu0  ;;  %5092 = vmatpush3.bf16.msra.mxu1 %v5727_v7 }
 0x1df   : > { %5093 = vmatprep.subr.bf16.mxu1 %v5728_v9 }
 0x1e0   : > { %2119 = vmatprep.mubr.bf16.mxu1 %v1265_v12 }
 0x1e1   : > { %2120 = vmatmul.mubr.bf16.gmra.mrb[44].mxu1 %v1261_v44 }
 0x1e2   : > { %5094 = vmatpush3.bf16.msra.mxu1 %v5729_v14 }
 0x1e3   : > { %v1147_v17 = vpop.f32.mrb[96].mxu0  ;;  %5095 = vmatprep.subr.bf16.mxu1 %v5730_v15 }
 0x1e4   : > { %v1149_v19 = vpop.f32.mrb[97].mxu0 }
 0x1e5   : > { %v1150_v20 = vpop.f32.mrb[98].mxu0 }
 0x1e6   : > { %v1266_v21 = vpack.c.bf16 %v1150_v20, %v1147_v17  ;;  %v1152_v22 = vpop.f32.mrb[99].mxu0  ;;  %5096 = vmatpush3.bf16.msra.mxu1 %v5731_v16 }
 0x1e7   : > { %5385 = vmatprep.subr.bf16.mxu1 %v5732_v18 }
 0x1eb   : > { %v1155_v23 = vpop.f32.mrb[100].mxu0 }
 0x1ec   : > { %v1157_v24 = vpop.f32.mrb[101].mxu0 }
 0x1ed   : > { %v1158_v25 = vpop.f32.mrb[102].mxu0 }
 0x1ee   : > { %v1267_v26 = vpack.c.bf16 %v1158_v25, %v1155_v23  ;;  %v1160_v27 = vpop.f32.mrb[103].mxu0 }
 0x1f3   : > { %v1163_v28 = vpop.f32.mrb[104].mxu0 }
 0x1f4   : > { %v1165_v29 = vpop.f32.mrb[105].mxu0 }
 0x1f5   : > { %v1166_v30 = vpop.f32.mrb[106].mxu0 }
 0x1f6   : > { %v1268_v31 = vpack.c.bf16 %v1166_v30, %v1163_v28  ;;  %v1168_v32 = vpop.f32.mrb[107].mxu0 }
 0x1fb   : > { %v1171_v33 = vpop.f32.mrb[108].mxu0 }
 0x1fc   : > { %v1173_v34 = vpop.f32.mrb[109].mxu0 }
 0x1fd   : > { %v1174_v35 = vpop.f32.mrb[110].mxu0 }
 0x1fe   : > { %v1269_v36 = vpack.c.bf16 %v1174_v35, %v1171_v33  ;;  %v1176_v37 = vpop.f32.mrb[111].mxu0 }
 0x203   : > { %v1179_v38 = vpop.f32.mrb[112].mxu0 }
 0x204   : > { %v1181_v39 = vpop.f32.mrb[113].mxu0 }
 0x205   : > { %v1182_v40 = vpop.f32.mrb[114].mxu0 }
 0x206   : > { %v1270_v41 = vpack.c.bf16 %v1182_v40, %v1179_v38  ;;  %v1184_v42 = vpop.f32.mrb[115].mxu0 }
 0x208   : > { %2160 = vmatprep.mubr.bf16.mxu1 %v1270_v41 }
 0x209   : > { %2161 = vmatmul.mubr.bf16.vlgmr.msra.gmra.mrb[48].mxu1 %v1266_v21 }
 0x20a   : > { %5386 = vmatpush3.bf16.msra.mxu1 %v5732_v18 }
 0x20b   : > { %v1187_v44 = vpop.f32.mrb[116].mxu0  ;;  %5387 = vmatprep.subr.bf16.mxu1 %v5733_v43 }
 0x20c   : > { %v1189_v46 = vpop.f32.mrb[117].mxu0 }
 0x20d   : > { %v1190_v47 = vpop.f32.mrb[118].mxu0 }
 0x20e   : > { %v1271_v48 = vpack.c.bf16 %v1190_v47, %v1187_v44  ;;  %v1192_v49 = vpop.f32.mrb[119].mxu0  ;;  %5388 = vmatpush3.bf16.msra.mxu1 %v5733_v43 }
 0x20f   : > { %5389 = vmatprep.subr.bf16.mxu1 %v5734_v45 }
 0x210   : > { %2168 = vmatprep.mubr.bf16.mxu1 %v1271_v48 }
 0x211   : > { %2169 = vmatmul.mubr.bf16.gmra.mrb[52].mxu1 %v1267_v26 }
 0x212   : > { %5390 = vmatpush3.bf16.msra.mxu1 %v5734_v45  ;;  %v4684_v45 = vld [vmem:[%s7108_s3] ss:$0 sm:$0xff] }
 0x213   : > { %v1195_v51 = vpop.f32.mrb[120].mxu0  ;;  %5391 = vmatprep.subr.bf16.mxu1 %v5735_v50 }
 0x214   : > { %v1197_v53 = vpop.f32.mrb[121].mxu0 }
 0x215   : > { %v1198_v54 = vpop.f32.mrb[122].mxu0 }
 0x216   : > { %v1272_v55 = vpack.c.bf16 %v1198_v54, %v1195_v51  ;;  %v1200_v56 = vpop.f32.mrb[123].mxu0  ;;  %5392 = vmatpush3.bf16.msra.mxu1 %v5735_v50 }
 0x217   : > { %5393 = vmatprep.subr.bf16.mxu1 %v5736_v52 }
 0x218   : > { %2176 = vmatprep.mubr.bf16.mxu1 %v1272_v55 }
 0x219   : > { %2177 = vmatmul.mubr.bf16.gmra.mrb[56].mxu1 %v1268_v31 }
 0x21a   : > { %5394 = vmatpush3.bf16.msra.mxu1 %v5736_v52 }
 0x21b   : > { %v1203_v58 = vpop.f32.mrb[124].mxu0  ;;  %5395 = vmatprep.subr.bf16.mxu1 %v5737_v57 }
 0x21c   : > { %v1205_v60 = vpop.f32.mrb[125].mxu0  ;;  %v4977_v61 = vpop.f32.mrb[0].mxu1 }
 0x21d   : > { %v1206_v62 = vpop.f32.mrb[126].mxu0  ;;  %v4978_v63 = vpop.f32.mrb[1].mxu1 }
 0x21e   : > { %v1273_v0 = vpack.c.bf16 %v1206_v62, %v1203_v58  ;;  %v4979_v1 = vadd.f32 %v4978_v63, %v4977_v61  ;;  %v1208_v2 = vpop.f32.mrb[127].mxu0  ;;  %v4980_v3 = vpop.f32.mrb[2].mxu1  ;;  %5396 = vmatpush3.bf16.msra.mxu1 %v5737_v57 }
 0x21f   : > { %v4981_v4 = vpop.f32.mrb[3].mxu1  ;;  %5397 = vmatprep.subr.bf16.mxu1 %v5738_v59 }
 0x220   : > { %v4982_v6 = vadd.f32 %v4981_v4, %v4980_v3  ;;  %2184 = vmatprep.mubr.bf16.mxu1 %v1273_v0  ;;  %v1968_v48 = vadd.f32 %v4979_v1, %v4684_v45 }
 0x221   : > { %2185 = vmatmul.mubr.bf16.gmra.mrb[60].mxu1 %v1269_v36 }
 0x222   : > { %5398 = vmatpush3.bf16.msra.mxu1 %v5738_v59  ;;  %v1971_v52 = vadd.f32 %v4982_v6, %v4684_v45 }
 0x223   : > { %v1211_v7 = vpop.f32.mrb[128].mxu0  ;;  %5399 = vmatprep.subr.bf16.mxu1 %v5739_v5 }
 0x224   : > { %v1213_v8 = vpop.f32.mrb[129].mxu0  ;;  %v4983_v9 = vpop.f32.mrb[4].mxu1 }
 0x225   : > { %v1214_v10 = vpop.f32.mrb[130].mxu0  ;;  %v4984_v11 = vpop.f32.mrb[5].mxu1 }
 0x226   : > { %v1274_v12 = vpack.c.bf16 %v1214_v10, %v1211_v7  ;;  %v4985_v13 = vadd.f32 %v4984_v11, %v4983_v9  ;;  %v1216_v14 = vpop.f32.mrb[131].mxu0  ;;  %v4986_v15 = vpop.f32.mrb[6].mxu1  ;;  %5400 = vmatpush3.bf16.msra.mxu1 %v5739_v5 }
 0x227   : > { %v4987_v16 = vpop.f32.mrb[7].mxu1 }
 0x228   : > { %v4988_v17 = vadd.f32 %v4987_v16, %v4986_v15  ;;  %5401 = vmatprep.mubr.bf16.mxu1 %v1274_v12  ;;  %v1976_v58 = vadd.f32 %v4985_v13, %v4684_v45 }
 0x22a   : > { %v1979_v62 = vadd.f32 %v4988_v17, %v4684_v45 }
 0x22b   : > { %v1219_v18 = vpop.f32.mrb[132].mxu0 }
 0x22c   : > { %v1221_v19 = vpop.f32.mrb[133].mxu0  ;;  %v4989_v20 = vpop.f32.mrb[8].mxu1 }
 0x22d   : > { %v1222_v21 = vpop.f32.mrb[134].mxu0  ;;  %v4990_v22 = vpop.f32.mrb[9].mxu1 }
 0x22e   : > { %v1275_v23 = vpack.c.bf16 %v1222_v21, %v1219_v18  ;;  %v4991_v24 = vadd.f32 %v4990_v22, %v4989_v20  ;;  %v1224_v25 = vpop.f32.mrb[135].mxu0  ;;  %v4992_v26 = vpop.f32.mrb[10].mxu1 }
 0x22f   : > { %v4993_v27 = vpop.f32.mrb[11].mxu1 }
 0x230   : > { %v4994_v28 = vadd.f32 %v4993_v27, %v4992_v26  ;;  %5402 = vmatmul.mubr.bf16.vlgmr.msra.gmra.mrb[64].mxu1 %v1275_v23  ;;  %v1984_v1 = vadd.f32 %v4991_v24, %v4684_v45 }
 0x232   : > { %v1987_v6 = vadd.f32 %v4994_v28, %v4684_v45 }
 0x233   : > { %v1227_v29 = vpop.f32.mrb[136].mxu0 }
 0x234   : > { %v1229_v30 = vpop.f32.mrb[137].mxu0  ;;  %v4995_v31 = vpop.f32.mrb[12].mxu1 }
 0x235   : > { %v1230_v32 = vpop.f32.mrb[138].mxu0  ;;  %v4996_v33 = vpop.f32.mrb[13].mxu1  ;;  %v5740_v30 = vld [vmem:[%s7109_s4] sm:$0xff]  }
 0x236   : > { %v1276_v34 = vpack.c.bf16 %v1230_v32, %v1227_v29  ;;  %v4997_v35 = vadd.f32 %v4996_v33, %v4995_v31  ;;  %v1232_v36 = vpop.f32.mrb[139].mxu0  ;;  %v4998_v37 = vpop.f32.mrb[14].mxu1 }
 0x237   : > { %v4999_v38 = vpop.f32.mrb[15].mxu1 }
 0x238   : > { %v5000_v39 = vadd.f32 %v4999_v38, %v4998_v37  ;;  %5405 = vmatprep.mubr.bf16.mxu1 %v1276_v34  ;;  %v1992_v13 = vadd.f32 %v4997_v35, %v4684_v45 }
 0x23a   : > { %v1995_v17 = vadd.f32 %v5000_v39, %v4684_v45 }
 0x23b   : > { %v1235_v40 = vpop.f32.mrb[140].mxu0 }
 0x23c   : > { %v1237_v41 = vpop.f32.mrb[141].mxu0 }
 0x23d   : > { %v1238_v42 = vpop.f32.mrb[142].mxu0 }
 0x23e   : > { %v1277_v43 = vpack.c.bf16 %v1238_v42, %v1235_v40  ;;  %v1240_v44 = vpop.f32.mrb[143].mxu0 }
 0x240   : > { %5406 = vmatmul.mubr.bf16.gmra.mrb[68].mxu1 %v1277_v43 }
 0x241   : > { %5417 = vmatprep.mubr.msk.bf16.mxu1 %vm2396_vm0, %v5740_v30 }
 0x25c   : > { %v5017_v46 = vpop.f32.mrb[16].mxu1 }
 0x25d   : > { %v5018_v47 = vpop.f32.mrb[17].mxu1 }
 0x25e   : > { %v5019_v49 = vadd.f32 %v5018_v47, %v5017_v46  ;;  %v5020_v50 = vpop.f32.mrb[18].mxu1 }
 0x25f   : > { %v5021_v51 = vpop.f32.mrb[19].mxu1 }
 0x260   : > { %v2033_v53 = vadd.f32 %v5019_v49, %v1968_v48  ;;  %v5022_v54 = vadd.f32 %v5021_v51, %v5020_v50 }
 0x262   : > { %v2036_v55 = vadd.f32 %v5022_v54, %v1971_v52 }
 0x264   : > { %v5023_v56 = vpop.f32.mrb[20].mxu1 }
 0x265   : > { %v5024_v57 = vpop.f32.mrb[21].mxu1 }
 0x266   : > { %v5025_v59 = vadd.f32 %v5024_v57, %v5023_v56  ;;  %v5026_v60 = vpop.f32.mrb[22].mxu1  ;;  %v5753_v56 = vld [vmem:[%s7110_s5 + $0x208] sm:$0xff]  }
 0x267   : > { %v5027_v61 = vpop.f32.mrb[23].mxu1 }
 0x268   : > { %v2041_v63 = vadd.f32 %v5025_v59, %v1976_v58  ;;  %v5028_v0 = vadd.f32 %v5027_v61, %v5026_v60 }
 0x26a   : > { %v2044_v2 = vadd.f32 %v5028_v0, %v1979_v62 }
 0x26c   : > { %v5029_v3 = vpop.f32.mrb[24].mxu1 }
 0x26d   : > { %v5030_v4 = vpop.f32.mrb[25].mxu1 }
 0x26e   : > { %v5031_v5 = vadd.f32 %v5030_v4, %v5029_v3  ;;  %v5032_v7 = vpop.f32.mrb[26].mxu1  ;;  %v5760_v4 = vld [vmem:[%s7110_s5 + $0x210] sm:$0xff]  }
 0x26f   : > { %v5033_v8 = vpop.f32.mrb[27].mxu1 }
 0x270   : > { %v2049_v9 = vadd.f32 %v5031_v5, %v1984_v1  ;;  %v5034_v10 = vadd.f32 %v5033_v8, %v5032_v7  ;;  %v5761_v1 = vld [vmem:[%s7110_s5 + $0x218] sm:$0xff]  }
 0x272   : > { %v2052_v11 = vadd.f32 %v5034_v10, %v1987_v6  ;;  %v5770_v10 = vld [vmem:[%s7110_s5 + $0x220] sm:$0xff]  }
 0x274   : > { %v5035_v12 = vpop.f32.mrb[28].mxu1 }
 0x275   : > { %v5036_v14 = vpop.f32.mrb[29].mxu1 }
 0x276   : > { %v5037_v15 = vadd.f32 %v5036_v14, %v5035_v12  ;;  %v5038_v16 = vpop.f32.mrb[30].mxu1 }
 0x277   : > { %v5039_v18 = vpop.f32.mrb[31].mxu1 }
 0x278   : > { %v2057_v19 = vadd.f32 %v5037_v15, %v1992_v13  ;;  %v5040_v20 = vadd.f32 %v5039_v18, %v5038_v16 }
 0x27a   : > { %v2060_v21 = vadd.f32 %v5040_v20, %v1995_v17 }
 0x29c   : > { %v5057_v22 = vpop.f32.mrb[32].mxu1 }
 0x29d   : > { %v5058_v23 = vpop.f32.mrb[33].mxu1 }
 0x29e   : > { %v5059_v24 = vadd.f32 %v5058_v23, %v5057_v22  ;;  %v5060_v25 = vpop.f32.mrb[34].mxu1 }
 0x29f   : > { %v5061_v26 = vpop.f32.mrb[35].mxu1 }
 0x2a0   : > { %v2098_v27 = vadd.f32 %v5059_v24, %v2033_v53  ;;  %v5062_v28 = vadd.f32 %v5061_v26, %v5060_v25 }
 0x2a2   : > { %v2101_v29 = vadd.f32 %v5062_v28, %v2036_v55  ;;  %v5748_v55 = vld [vmem:[%s7110_s5 + $0x200] sm:$0xff]  }
 0x2a3   : > { %5453 = vmatprep.subr.bf16.mxu0 %v5748_v55 }
 0x2a4   : > { %v5063_v31 = vpop.f32.mrb[36].mxu1  ;;  %5454 = vmatpush3.bf16.msra.mxu0 %v5748_v55 }
 0x2a5   : > { %v5064_v32 = vpop.f32.mrb[37].mxu1  ;;  %5455 = vmatprep.subr.bf16.mxu0 %v5753_v56 }
 0x2a6   : > { %v5065_v33 = vadd.f32 %v5064_v32, %v5063_v31  ;;  %v5066_v34 = vpop.f32.mrb[38].mxu1 }
 0x2a7   : > { %v5067_v35 = vpop.f32.mrb[39].mxu1 }
 0x2a8   : > { %v2106_v36 = vadd.f32 %v5065_v33, %v2041_v63  ;;  %v5068_v37 = vadd.f32 %v5067_v35, %v5066_v34  ;;  %5456 = vmatpush3.bf16.msra.mxu0 %v5753_v56  ;;  %v5762_v56 = vld [vmem:[%s7110_s5 + $0x40] sm:$0xff]  }
 0x2a9   : > { %5457 = vmatprep.subr.bf16.mxu0 %v5760_v4 }
 0x2aa   : > { %v2109_v38 = vadd.f32 %v5068_v37, %v2044_v2 }
 0x2ac   : > { %v5069_v39 = vpop.f32.mrb[40].mxu1  ;;  %5458 = vmatpush3.bf16.msra.mxu0 %v5760_v4  ;;  %v5769_v4 = vld [vmem:[%s7110_s5 + $0x18] sm:$0xff]  }
 0x2ad   : > { %v5070_v40 = vpop.f32.mrb[41].mxu1  ;;  %5459 = vmatprep.subr.bf16.mxu0 %v5761_v1 }
 0x2ae   : > { %v5071_v41 = vadd.f32 %v5070_v40, %v5069_v39  ;;  %v5072_v42 = vpop.f32.mrb[42].mxu1 }
 0x2af   : > { %v5073_v43 = vpop.f32.mrb[43].mxu1 }
 0x2b0   : > { %v2114_v44 = vadd.f32 %v5071_v41, %v2049_v9  ;;  %v5074_v45 = vadd.f32 %v5073_v43, %v5072_v42  ;;  %5460 = vmatpush3.bf16.msra.mxu0 %v5761_v1  ;;  %v5771_v1 = vld [vmem:[%s7110_s5 + $0x60] sm:$0xff]  }
 0x2b1   : > { %5461 = vmatprep.subr.bf16.mxu0 %v5770_v10 }
 0x2b2   : > { %v2117_v46 = vadd.f32 %v5074_v45, %v2052_v11 }
 0x2b4   : > { %v5075_v47 = vpop.f32.mrb[44].mxu1  ;;  %5462 = vmatpush3.bf16.msra.mxu0 %v5770_v10  ;;  %v5775_v10 = vld [vmem:[%s7110_s5 + $0x70] sm:$0xff]  }
 0x2b5   : > { %v5076_v48 = vpop.f32.mrb[45].mxu1 }
 0x2b6   : > { %v5077_v49 = vadd.f32 %v5076_v48, %v5075_v47  ;;  %v5078_v50 = vpop.f32.mrb[46].mxu1 }
 0x2b7   : > { %v5079_v51 = vpop.f32.mrb[47].mxu1 }
 0x2b8   : > { %v2122_v52 = vadd.f32 %v5077_v49, %v2057_v19  ;;  %v5080_v53 = vadd.f32 %v5079_v51, %v5078_v50 }
 0x2ba   : > { %v2125_v54 = vadd.f32 %v5080_v53, %v2060_v21 }
 0x2dc   : > { %v5097_v57 = vpop.f32.mrb[48].mxu1 }
 0x2dd   : > { %v5098_v58 = vpop.f32.mrb[49].mxu1 }
 0x2de   : > { %v5099_v59 = vadd.f32 %v5098_v58, %v5097_v57  ;;  %v5100_v60 = vpop.f32.mrb[50].mxu1  ;;  %v5741_v57 = vld [vmem:[%s7109_s4 + $0x8] sm:$0xff]   ;;  %v5742_v58 = vld [vmem:[%s7109_s4 + $0x10] sm:$0xff]  }
 0x2df   : > { %v5101_v61 = vpop.f32.mrb[51].mxu1 }
 0x2e0   : > { %v5102_v62 = vadd.f32 %v5101_v61, %v5100_v60  ;;  %v2163_v63 = vadd.f32 %v5099_v59, %v2098_v27  ;;  %v5763_v59 = vld [vmem:[%s7110_s5] sm:$0xff]   ;;  %v5764_v60 = vld [vmem:[%s7110_s5 + $0x48] sm:$0xff]  }
 0x2e1   : > { %v5765_v61 = vld [vmem:[%s7110_s5 + $0x8] sm:$0xff]  }
 0x2e2   : > { %v2166_v0 = vadd.f32 %v5102_v62, %v2101_v29  ;;  %v5766_v62 = vld [vmem:[%s7110_s5 + $0x50] sm:$0xff]  }
 0x2e4   : > { %v5103_v2 = vpop.f32.mrb[52].mxu1 }
 0x2e5   : > { %v5104_v3 = vpop.f32.mrb[53].mxu1 }
 0x2e6   : > { %v5105_v5 = vadd.f32 %v5104_v3, %v5103_v2  ;;  %v5106_v7 = vpop.f32.mrb[54].mxu1  ;;  %v5767_v2 = vld [vmem:[%s7110_s5 + $0x10] sm:$0xff]   ;;  %v5768_v3 = vld [vmem:[%s7110_s5 + $0x58] sm:$0xff]  }
 0x2e7   : > { %v5107_v8 = vpop.f32.mrb[55].mxu1 }
 0x2e8   : > { %v5108_v6 = vadd.f32 %v5107_v8, %v5106_v7  ;;  %v2171_v9 = vadd.f32 %v5105_v5, %v2106_v36  ;;  %v5745_v5 = vld [vmem:[%s7109_s4 + $0x28] sm:$0xff]   ;;  %v5746_v7 = vld [vmem:[%s7109_s4 + $0x30] sm:$0xff]   ;;  %v5772_v8 = vld [vmem:[%s7110_s5 + $0x20] sm:$0xff]  }
 0x2ea   : > { %v2174_v11 = vadd.f32 %v5108_v6, %v2109_v38  ;;  %v5773_v6 = vld [vmem:[%s7110_s5 + $0x68] sm:$0xff]  }
 0x2ec   : > { %v5109_v12 = vpop.f32.mrb[56].mxu1 }
 0x2ed   : > { %v5110_v14 = vpop.f32.mrb[57].mxu1 }
 0x2ee   : > { %v5111_v13 = vadd.f32 %v5110_v14, %v5109_v12  ;;  %v5112_v15 = vpop.f32.mrb[58].mxu1  ;;  %v5749_v12 = vld [vmem:[%s7109_s4 + $0x40] sm:$0xff]   ;;  %v5776_v14 = vld [vmem:[%s7110_s5 + $0x30] sm:$0xff]  }
 0x2ef   : > { %v5113_v16 = vpop.f32.mrb[59].mxu1 }
 0x2f0   : > { %v5114_v18 = vadd.f32 %v5113_v16, %v5112_v15  ;;  %v2179_v17 = vadd.f32 %v5111_v13, %v2114_v44  ;;  %v5750_v13 = vld [vmem:[%s7109_s4 + $0x48] sm:$0xff]   ;;  %v5751_v15 = vld [vmem:[%s7109_s4 + $0x50] sm:$0xff]   ;;  %v5752_v16 = vld [vmem:[%s7109_s4 + $0x58] sm:$0xff]  }
 0x2f2   : > { %v2182_v19 = vadd.f32 %v5114_v18, %v2117_v46  ;;  %v5754_v18 = vld [vmem:[%s7109_s4 + $0x60] sm:$0xff]  }
 0x2f4   : > { %v5115_v20 = vpop.f32.mrb[60].mxu1 }
 0x2f5   : > { %v5116_v21 = vpop.f32.mrb[61].mxu1 }
 0x2f6   : > { %v5117_v22 = vadd.f32 %v5116_v21, %v5115_v20  ;;  %v5118_v23 = vpop.f32.mrb[62].mxu1  ;;  %v5757_v20 = vld [vmem:[%s7109_s4 + $0x78] sm:$0xff]   ;;  %v5758_v21 = vld [vmem:[%s7109_s4 + $0x80] sm:$0xff]  }
 0x2f7   : > { %v5119_v24 = vpop.f32.mrb[63].mxu1 }
 0x2f8   : > { %v5120_v25 = vadd.f32 %v5119_v24, %v5118_v23  ;;  %v2187_v26 = vadd.f32 %v5117_v22, %v2122_v52  ;;  %v5759_v22 = vld [vmem:[%s7109_s4 + $0x88] sm:$0xff]   ;;  %v5777_v23 = vld [vmem:[%s7110_s5 + $0x78] sm:$0xff]  }
 0x2f9   : > { %v5778_v24 = vld [vmem:[%s7110_s5 + $0x38] sm:$0xff]  }
 0x2fa   : > { %v2190_v27 = vadd.f32 %v5120_v25, %v2125_v54  ;;  %v5779_v25 = vld [vmem:[%s7110_s5 + $0x228] sm:$0xff]  }
 0x2fb   : > { %5463 = vmatprep.subr.bf16.mxu0 %v5779_v25 }
 0x2fc   : > { %5464 = vmatpush3.bf16.msra.mxu0 %v5779_v25 }
 0x303   : > { %v5403_v28 = vpop.f32.mrb[64].mxu1 }
 0x304   : > { %v2236_v29 = vadd.f32 %v5403_v28, %v2171_v9  ;;  %v2227_v30 = vpop.f32.mrb[65].mxu1  ;;  %v5774_v9 = vld [vmem:[%s7110_s5 + $0x28] sm:$0xff]   ;;  %v5816_v28 = vld [vmem:[%s7110_s5 + $0x238] sm:$0xff]  }
 0x305   : > { %v2228_v31 = vadd.f32 %v2227_v30, %v2163_v63  ;;  %v5404_v32 = vpop.f32.mrb[66].mxu1  ;;  %v5743_v63 = vld [vmem:[%s7109_s4 + $0x18] sm:$0xff]  }
 0x306   : > { %v2239_v33 = vadd.f32 %v5404_v32, %v2174_v11  ;;  %v2230_v34 = vpop.f32.mrb[67].mxu1  ;;  %v2260_v36 = vmax.f32 %v2236_v29, 0.0  ;;  %v5747_v11 = vld [vmem:[%s7109_s4 + $0x38] sm:$0xff]  }
 0x307   : > { %v2231_v35 = vadd.f32 %v2230_v34, %v2166_v0  ;;  %v2258_v38 = vmax.f32 %v2228_v31, 0.0  ;;  %v5744_v0 = vld [vmem:[%s7109_s4 + $0x20] sm:$0xff]  }
 0x308   : > { %v2261_v37 = vmax.f32 %v2239_v33, 0.0 }
 0x309   : > { %v2259_v39 = vmax.f32 %v2231_v35, 0.0 }
 0x30a   : > { %v2267_v40 = vpack.c.bf16 %v2261_v37, %v2260_v36 }
 0x30b   : > { %v2266_v41 = vpack.c.bf16 %v2259_v39, %v2258_v38 }
 0x30d   : > { %5409 = vmatprep.subr.bf16.mxu1 %v2266_v41 }
 0x30e   : > { %5410 = vmatpush3.bf16.msra.mxu1 %v2266_v41  ;;  %v5781_v41 = vld [vmem:[%s7110_s5 + $0x80] sm:$0xff]  }
 0x30f   : > { %5411 = vmatprep.subr.bf16.mxu1 %v2267_v40 }
 0x312   : > { %5412 = vmatpush3.bf16.msra.mxu1 %v2267_v40 }
 0x313   : > { %v5407_v42 = vpop.f32.mrb[68].mxu1 }
 0x314   : > { %v2252_v43 = vadd.f32 %v5407_v42, %v2187_v26  ;;  %v2243_v44 = vpop.f32.mrb[69].mxu1  ;;  %v5780_v26 = vld [vmem:[%s7110_s5 + $0xc0] sm:$0xff]   ;;  %v5782_v42 = vld [vmem:[%s7110_s5 + $0xc8] sm:$0xff]  }
 0x315   : > { %v2244_v45 = vadd.f32 %v2243_v44, %v2179_v17  ;;  %v5408_v46 = vpop.f32.mrb[70].mxu1  ;;  %v5755_v17 = vld [vmem:[%s7109_s4 + $0x68] sm:$0xff]  }
 0x316   : > { %v2255_v47 = vadd.f32 %v5408_v46, %v2190_v27  ;;  %v2246_v48 = vpop.f32.mrb[71].mxu1  ;;  %v2264_v50 = vmax.f32 %v2252_v43, 0.0  ;;  %v5797_v27 = vld [vmem:[%s7110_s5 + $0x230] sm:$0xff]   ;;  %v5783_v43 = vld [vmem:[%s7110_s5 + $0x88] sm:$0xff]  }
 0x317   : > { %v2247_v49 = vadd.f32 %v2246_v48, %v2182_v19  ;;  %v2262_v52 = vmax.f32 %v2244_v45, 0.0  ;;  %v5756_v19 = vld [vmem:[%s7109_s4 + $0x70] sm:$0xff]   ;;  %5465 = vmatprep.subr.bf16.mxu0 %v5797_v27 }
 0x318   : > { %v2265_v51 = vmax.f32 %v2255_v47, 0.0  ;;  %5466 = vmatpush3.bf16.msra.mxu0 %v5797_v27  ;;  %v5784_v45 = vld [vmem:[%s7110_s5 + $0xd0] sm:$0xff]  }
 0x319   : > { %v2263_v53 = vmax.f32 %v2247_v49, 0.0  ;;  %5467 = vmatprep.subr.bf16.mxu0 %v5816_v28 }
 0x31a   : > { %v2269_v54 = vpack.c.bf16 %v2265_v51, %v2264_v50  ;;  %v5785_v50 = vld [vmem:[%s7110_s5 + $0x90] sm:$0xff]  }
 0x31b   : > { %v2268_v55 = vpack.c.bf16 %v2263_v53, %v2262_v52  ;;  %v5786_v52 = vld [vmem:[%s7110_s5 + $0xd8] sm:$0xff]  }
 0x31c   : > { %5468 = vmatpush3.bf16.msra.mxu0 %v5816_v28  ;;  %v5787_v53 = vld [vmem:[%s7110_s5 + $0x98] sm:$0xff]  }
 0x31d   : > { %5413 = vmatprep.subr.bf16.mxu1 %v2268_v55  ;;  %v5803_v28 = vld [vmem:[%s7110_s5 + $0x158] sm:$0xff]  }
 0x31e   : > { %5414 = vmatpush3.bf16.msra.mxu1 %v2268_v55  ;;  %v5788_v55 = vld [vmem:[%s7110_s5 + $0xe0] sm:$0xff]  }
 0x31f   : > { %5415 = vmatprep.subr.bf16.mxu1 %v2269_v54 }
 0x322   : > { %5416 = vmatpush3.bf16.msra.mxu1 %v2269_v54 }
 0x323   : > { %5155 = vmatprep.subr.bf16.mxu1 %v5762_v56 }
 0x325   : > { %5418 = vmatmul.mubr.msk.bf16.vlgmr.msra.gmra.mrb[72].mxu1 %vm2396_vm0, %v5741_v57 }
 0x326   : > { %5421 = vmatprep.mubr.msk.bf16.mxu1 %vm2396_vm0, %v5742_v58  ;;  %5156 = vmatpush3.bf16.msra.mxu1 %v5763_v59 }
 0x327   : > { %5157 = vmatprep.subr.bf16.mxu1 %v5764_v60  ;;  %v5789_v60 = vld [vmem:[%s7110_s5 + $0xa0] sm:$0xff]  }
 0x32a   : > { %5158 = vmatpush3.bf16.msra.mxu1 %v5765_v61 }
 0x32b   : > { %5159 = vmatprep.subr.bf16.mxu1 %v5766_v62  ;;  %v5790_v62 = vld [vmem:[%s7110_s5 + $0xe8] sm:$0xff]  }
 0x32d   : > { %5422 = vmatmul.mubr.msk.bf16.gmra.mrb[76].mxu1 %vm2396_vm0, %v5743_v63  ;;  %v5791_v63 = vld [vmem:[%s7110_s5 + $0xa8] sm:$0xff]  }
 0x32e   : > { %5425 = vmatprep.mubr.msk.bf16.mxu1 %vm2396_vm0, %v5744_v0  ;;  %5160 = vmatpush3.bf16.msra.mxu1 %v5767_v2  ;;  %v5792_v2 = vld [vmem:[%s7110_s5 + $0xf0] sm:$0xff]  }
 0x32f   : > { %5161 = vmatprep.subr.bf16.mxu1 %v5768_v3 }
 0x332   : > { %5162 = vmatpush3.bf16.msra.mxu1 %v5769_v4 }
 0x333   : > { %5163 = vmatprep.subr.bf16.mxu1 %v5771_v1 }
 0x335   : > { %5426 = vmatmul.mubr.msk.bf16.gmra.mrb[80].mxu1 %vm2396_vm0, %v5745_v5 }
 0x336   : > { %5429 = vmatprep.mubr.msk.bf16.mxu1 %vm2396_vm0, %v5746_v7  ;;  %5164 = vmatpush3.bf16.msra.mxu1 %v5772_v8  ;;  %v5793_v7 = vld [vmem:[%s7110_s5 + $0xb0] sm:$0xff]  }
 0x337   : > { %5165 = vmatprep.subr.bf16.mxu1 %v5773_v6  ;;  %v5794_v6 = vld [vmem:[%s7110_s5 + $0xf8] sm:$0xff]  }
 0x33a   : > { %5166 = vmatpush3.bf16.msra.mxu1 %v5774_v9  ;;  %v5795_v9 = vld [vmem:[%s7110_s5 + $0xb8] sm:$0xff]  }
 0x33b   : > { %5167 = vmatprep.subr.bf16.mxu1 %v5775_v10 }
 0x33d   : > { %5430 = vmatmul.mubr.msk.bf16.gmra.mrb[84].mxu1 %vm2396_vm0, %v5747_v11  ;;  %v5796_v11 = vld [vmem:[%s7110_s5 + $0x140] sm:$0xff]  }
 0x33e   : > { %5433 = vmatprep.mubr.msk.bf16.mxu1 %vm2396_vm0, %v5749_v12  ;;  %5168 = vmatpush3.bf16.msra.mxu1 %v5776_v14 }
 0x33f   : > { %5169 = vmatprep.subr.bf16.mxu1 %v5777_v23 }
 0x342   : > { %5170 = vmatpush3.bf16.msra.mxu1 %v5778_v24 }
 0x343   : > { %5183 = vmatprep.subr.bf16.mxu1 %v5780_v26  ;;  %v5802_v26 = vld [vmem:[%s7110_s5 + $0x110] sm:$0xff]  }
 0x345   : > { %5434 = vmatmul.mubr.msk.bf16.gmra.mrb[88].mxu1 %vm2396_vm0, %v5750_v13 }
 0x346   : > { %5437 = vmatprep.mubr.msk.bf16.mxu1 %vm2396_vm0, %v5751_v15 }
 0x34d   : > { %5438 = vmatmul.mubr.msk.bf16.gmra.mrb[92].mxu1 %vm2396_vm0, %v5752_v16  ;;  %v5798_v16 = vld [vmem:[%s7110_s5 + $0x100] sm:$0xff]  }
 0x34e   : > { %5441 = vmatprep.mubr.msk.bf16.mxu1 %vm2396_vm0, %v5754_v18 }
 0x355   : > { %5442 = vmatmul.mubr.msk.bf16.gmra.mrb[96].mxu1 %vm2396_vm0, %v5755_v17  ;;  %v5799_v17 = vld [vmem:[%s7110_s5 + $0x148] sm:$0xff]  }
 0x356   : > { %5445 = vmatprep.mubr.msk.bf16.mxu1 %vm2396_vm0, %v5756_v19  ;;  %v5800_v19 = vld [vmem:[%s7110_s5 + $0x108] sm:$0xff]  }
 0x35d   : > { %5446 = vmatmul.mubr.msk.bf16.gmra.mrb[100].mxu1 %vm2396_vm0, %v5757_v20 }
 0x35e   : > { %5449 = vmatprep.mubr.msk.bf16.mxu1 %vm2396_vm0, %v5758_v21  ;;  %v5801_v21 = vld [vmem:[%s7110_s5 + $0x150] sm:$0xff]  }
 0x365   : > { %5450 = vmatmul.mubr.msk.bf16.gmra.mrb[104].mxu1 %vm2396_vm0, %v5759_v22 }
 0x3f8   : > { %v5419_v29 = vpop.f32.mrb[72].mxu1 }
 0x3f9   : > { %v2485_v30 = vpop.f32.mrb[73].mxu1 }
 0x3fa   : > { %v5420_v31 = vpop.f32.mrb[74].mxu1 }
 0x3fb   : > { %v2629_v32 = vpack.c.bf16 %v5420_v31, %v5419_v29  ;;  %v2488_v33 = vpop.f32.mrb[75].mxu1  ;;  %v5804_v29 = vld [vmem:[%s7110_s5 + $0x118] sm:$0xff]   ;;  %v5805_v31 = vld [vmem:[%s7110_s5 + $0x160] sm:$0xff]  }
 0x3fc   : > { %v2628_v34 = vpack.c.bf16 %v2488_v33, %v2485_v30 }
 0x400   : > { %v5423_v35 = vpop.f32.mrb[76].mxu1 }
 0x401   : > { %v2501_v36 = vpop.f32.mrb[77].mxu1 }
 0x402   : > { %v5424_v37 = vpop.f32.mrb[78].mxu1 }
 0x403   : > { %v2631_v38 = vpack.c.bf16 %v5424_v37, %v5423_v35  ;;  %v2504_v39 = vpop.f32.mrb[79].mxu1 }
 0x404   : > { %v2630_v40 = vpack.c.bf16 %v2504_v39, %v2501_v36  ;;  %v5806_v36 = vld [vmem:[%s7110_s5 + $0x120] sm:$0xff]   ;;  %v5808_v39 = vld [vmem:[%s7110_s5 + $0x128] sm:$0xff]  }
 0x406   : > { %3297 = vmatprep.mubr.bf16.mxu1 %v2630_v40 }
 0x407   : > { %3298 = vmatmul.mubr.bf16.vlgmr.msra.gmra.mrb[108].mxu1 %v2628_v34 }
 0x408   : > { %5184 = vmatpush3.bf16.msra.mxu1 %v5781_v41  ;;  %3305 = vmatprep.mubr.bf16.mxu1 %v2631_v38  ;;  %v6615_v44 = vpop.f32.mrb[80].mxu1  ;;  %v5807_v38 = vld [vmem:[%s7110_s5 + $0x168] sm:$0xff]   ;;  %v5809_v41 = vld [vmem:[%s7110_s5 + $0x170] sm:$0xff]  }
 0x409   : > { %5185 = vmatprep.subr.bf16.mxu1 %v5782_v42  ;;  %v2517_v46 = vpop.f32.mrb[81].mxu1 }
 0x40a   : > { %v6620_v47 = vpop.f32.mrb[82].mxu1 }
 0x40b   : > { %v2633_v48 = vpack.c.bf16 %v6620_v47, %v6615_v44  ;;  %v2520_v49 = vpop.f32.mrb[83].mxu1 }
 0x40c   : > { %5186 = vmatpush3.bf16.msra.mxu1 %v5783_v43  ;;  %v2632_v51 = vpack.c.bf16 %v2520_v49, %v2517_v46  ;;  %v5810_v46 = vld [vmem:[%s7110_s5 + $0x130] sm:$0xff]   ;;  %v5812_v49 = vld [vmem:[%s7110_s5 + $0x138] sm:$0xff]  }
 0x40d   : > { %5187 = vmatprep.subr.bf16.mxu1 %v5784_v45 }
 0x40f   : > { %3306 = vmatmul.mubr.bf16.gmra.mrb[112].mxu1 %v2629_v32 }
 0x410   : > { %5188 = vmatpush3.bf16.msra.mxu1 %v5785_v50  ;;  %v5431_v54 = vpop.f32.mrb[84].mxu1  ;;  %v5813_v50 = vld [vmem:[%s7110_s5 + $0x1c0] sm:$0xff]  }
 0x411   : > { %5189 = vmatprep.subr.bf16.mxu1 %v5786_v52  ;;  %v2533_v56 = vpop.f32.mrb[85].mxu1  ;;  %v5815_v52 = vld [vmem:[%s7110_s5 + $0x1c8] sm:$0xff]  }
 0x412   : > { %v5432_v57 = vpop.f32.mrb[86].mxu1 }
 0x413   : > { %v2635_v58 = vpack.c.bf16 %v5432_v57, %v5431_v54  ;;  %v2536_v59 = vpop.f32.mrb[87].mxu1  ;;  %v5818_v54 = vld [vmem:[%s7110_s5 + $0x1d0] sm:$0xff]   ;;  %v5821_v57 = vld [vmem:[%s7110_s5 + $0x198] sm:$0xff]  }
 0x414   : > { %5190 = vmatpush3.bf16.msra.mxu1 %v5787_v53  ;;  %v2634_v61 = vpack.c.bf16 %v2536_v59, %v2533_v56  ;;  %v5817_v53 = vld [vmem:[%s7110_s5 + $0x188] sm:$0xff]   ;;  %v5820_v56 = vld [vmem:[%s7110_s5 + $0x1d8] sm:$0xff]   ;;  %v5823_v59 = vld [vmem:[%s7110_s5 + $0x1a0] sm:$0xff]  }
 0x415   : > { %5191 = vmatprep.subr.bf16.mxu1 %v5788_v55  ;;  %v5819_v55 = vld [vmem:[%s7110_s5 + $0x190] sm:$0xff]  }
 0x416   : > { %3346 = vmatprep.mubr.bf16.mxu1 %v2634_v61  ;;  %v5825_v61 = vld [vmem:[%s7110_s5 + $0x1a8] sm:$0xff]  }
 0x418   : > { %5192 = vmatpush3.bf16.msra.mxu1 %v5789_v60  ;;  %v6645_v0 = vpop.f32.mrb[88].mxu1  ;;  %v5824_v60 = vld [vmem:[%s7110_s5 + $0x1e8] sm:$0xff]  }
 0x419   : > { %5193 = vmatprep.subr.bf16.mxu1 %v5790_v62  ;;  %v6650_v3 = vpop.f32.mrb[89].mxu1  ;;  %v5826_v62 = vld [vmem:[%s7110_s5 + $0x1f0] sm:$0xff]  }
 0x41a   : > { %v6652_v4 = vpop.f32.mrb[90].mxu1 }
 0x41b   : > { %v2637_v1 = vpack.c.bf16 %v6652_v4, %v6645_v0  ;;  %v6656_v5 = vpop.f32.mrb[91].mxu1  ;;  %v5828_v0 = vld [vmem:[%s7110_s5 + $0x1f8] sm:$0xff]  }
 0x41c   : > { %5194 = vmatpush3.bf16.msra.mxu1 %v5791_v63  ;;  %v2636_v8 = vpack.c.bf16 %v6656_v5, %v6650_v3  ;;  %v5827_v63 = vld [vmem:[%s7110_s5 + $0x1b0] sm:$0xff]   ;;  %v5920_v3 = vmov 0.0  }
 0x41d   : > { %5195 = vmatprep.subr.bf16.mxu1 %v5792_v2  ;;  %v5829_v2 = vld [vmem:[%s7110_s5 + $0x1b8] sm:$0xff]   ;;  %5473 = vmatprep.subr.bf16.mxu0 %v5920_v3 }
 0x420   : > { %5196 = vmatpush3.bf16.msra.mxu1 %v5793_v7  ;;  %v6669_v10 = vpop.f32.mrb[92].mxu1 }
 0x421   : > { %5197 = vmatprep.subr.bf16.mxu1 %v5794_v6  ;;  %v2565_v12 = vpop.f32.mrb[93].mxu1 }
 0x422   : > { %v6674_v14 = vpop.f32.mrb[94].mxu1 }
 0x423   : > { %v2639_v13 = vpack.c.bf16 %v6674_v14, %v6669_v10  ;;  %v2568_v15 = vpop.f32.mrb[95].mxu1 }
 0x424   : > { %5198 = vmatpush3.bf16.msra.mxu1 %v5795_v9  ;;  %v2638_v18 = vpack.c.bf16 %v2568_v15, %v2565_v12  ;;  %v4793_v15 = vld [vmem:[%s7111_s6] ss:$0 sm:$0xff] }
 0x425   : > { %5211 = vmatprep.subr.bf16.mxu1 %v5796_v11 }
 0x427   : > { %3347 = vmatmul.mubr.bf16.vlgmr.msra.gmra.mrb[116].mxu1 %v2632_v51  ;;  %v5814_v51 = vld [vmem:[%s7110_s5 + $0x180] sm:$0xff]  }
 0x428   : > { %3354 = vmatprep.mubr.bf16.mxu1 %v2635_v58  ;;  %5212 = vmatpush3.bf16.msra.mxu1 %v5798_v16  ;;  %v6687_v20 = vpop.f32.mrb[96].mxu1  ;;  %v5822_v58 = vld [vmem:[%s7110_s5 + $0x1e0] sm:$0xff]  }
 0x429   : > { %5213 = vmatprep.subr.bf16.mxu1 %v5799_v17  ;;  %v6692_v22 = vpop.f32.mrb[97].mxu1 }
 0x42a   : > { %v6694_v23 = vpop.f32.mrb[98].mxu1 }
 0x42b   : > { %v2641_v24 = vpack.c.bf16 %v6694_v23, %v6687_v20  ;;  %v6698_v25 = vpop.f32.mrb[99].mxu1 }
 0x42c   : > { %5214 = vmatpush3.bf16.msra.mxu1 %v5800_v19  ;;  %v2640_v27 = vpack.c.bf16 %v6698_v25, %v6692_v22 }
 0x42d   : > { %5215 = vmatprep.subr.bf16.mxu1 %v5801_v21 }
 0x42f   : > { %3355 = vmatmul.mubr.bf16.gmra.mrb[120].mxu1 %v2633_v48  ;;  %v5811_v48 = vld [vmem:[%s7110_s5 + $0x178] sm:$0xff]  }
 0x430   : > { %5216 = vmatpush3.bf16.msra.mxu1 %v5802_v26  ;;  %3395 = vmatprep.mubr.bf16.mxu1 %v2638_v18  ;;  %v6714_v30 = vpop.f32.mrb[100].mxu1 }
 0x431   : > { %5217 = vmatprep.subr.bf16.mxu1 %v5803_v28  ;;  %v2597_v32 = vpop.f32.mrb[101].mxu1 }
 0x432   : > { %v6719_v33 = vpop.f32.mrb[102].mxu1 }
 0x433   : > { %v2643_v34 = vpack.c.bf16 %v6719_v33, %v6714_v30  ;;  %v2600_v35 = vpop.f32.mrb[103].mxu1 }
 0x434   : > { %5218 = vmatpush3.bf16.msra.mxu1 %v5804_v29  ;;  %v2642_v37 = vpack.c.bf16 %v2600_v35, %v2597_v32 }
 0x435   : > { %5219 = vmatprep.subr.bf16.mxu1 %v5805_v31 }
 0x438   : > { %5220 = vmatpush3.bf16.msra.mxu1 %v5806_v36  ;;  %v5451_v40 = vpop.f32.mrb[104].mxu1 }
 0x439   : > { %5221 = vmatprep.subr.bf16.mxu1 %v5807_v38  ;;  %v2613_v42 = vpop.f32.mrb[105].mxu1  ;;  %v5841_v38 = vld [vmem:[%s7113_s8 + $0x40] sm:$0xff]  }
 0x43a   : > { %v5452_v43 = vpop.f32.mrb[106].mxu1 }
 0x43b   : > { %v2645_v44 = vpack.c.bf16 %v5452_v43, %v5451_v40  ;;  %v2616_v45 = vpop.f32.mrb[107].mxu1  ;;  %v5842_v40 = vld [vmem:[%s7113_s8] sm:$0xff]   ;;  %v5844_v43 = vld [vmem:[%s7113_s8 + $0x8] sm:$0xff]  }
 0x43c   : > { %5222 = vmatpush3.bf16.msra.mxu1 %v5808_v39  ;;  %v2644_v47 = vpack.c.bf16 %v2616_v45, %v2613_v42 }
 0x43d   : > { %5223 = vmatprep.subr.bf16.mxu1 %v5809_v41  ;;  %v5843_v41 = vld [vmem:[%s7113_s8 + $0x48] sm:$0xff]  }
 0x43e   : > { %5469 = vmatprep.mubr.bf16.mxu0 %v2644_v47 }
 0x43f   : > { %5470 = vmatmul.mubr.bf16.vlgmr.msra.gmra.mrb[144].mxu0 %v2645_v44  ;;  %v5846_v44 = vld [vmem:[%s7113_s8 + $0x50] sm:$0xff]  }
 0x440   : > { %5224 = vmatpush3.bf16.msra.mxu1 %v5810_v46  ;;  %5477 = vmatprep.mubr.msk.bf16.mxu0 %vm5921_vm1, %v5920_v3  ;;  %v5848_v46 = vld [vmem:[%s7113_s8 + $0x10] sm:$0xff]  }
 0x441   : > { %5225 = vmatprep.subr.bf16.mxu1 %v5811_v48  ;;  %v5849_v48 = vld [vmem:[%s7113_s8 + $0x58] sm:$0xff]  }
 0x444   : > { %5226 = vmatpush3.bf16.msra.mxu1 %v5812_v49 }
 0x445   : > { %5239 = vmatprep.subr.bf16.mxu1 %v5813_v50 }
 0x447   : > { %3396 = vmatmul.mubr.bf16.vlgmr.msra.gmra.mrb[124].mxu1 %v2636_v8 }
 0x448   : > { %3403 = vmatprep.mubr.bf16.mxu1 %v2639_v13  ;;  %5240 = vmatpush3.bf16.msra.mxu1 %v5814_v51 }
 0x449   : > { %5241 = vmatprep.subr.bf16.mxu1 %v5815_v52 }
 0x44c   : > { %5242 = vmatpush3.bf16.msra.mxu1 %v5817_v53 }
 0x44d   : > { %5243 = vmatprep.subr.bf16.mxu1 %v5818_v54  ;;  %v5850_v54 = vld [vmem:[%s7113_s8 + $0x18] sm:$0xff]  }
 0x44f   : > { %3404 = vmatmul.mubr.bf16.gmra.mrb[128].mxu1 %v2637_v1 }
 0x450   : > { %5244 = vmatpush3.bf16.msra.mxu1 %v5819_v55  ;;  %3444 = vmatprep.mubr.bf16.mxu1 %v2642_v37  ;;  %v5851_v55 = vld [vmem:[%s7113_s8 + $0x60] sm:$0xff]  }
 0x451   : > { %5245 = vmatprep.subr.bf16.mxu1 %v5820_v56 }
 0x454   : > { %5246 = vmatpush3.bf16.msra.mxu1 %v5821_v57 }
 0x455   : > { %5247 = vmatprep.subr.bf16.mxu1 %v5822_v58  ;;  %v5853_v58 = vld [vmem:[%s7113_s8 + $0x20] sm:$0xff]  }
 0x458   : > { %5248 = vmatpush3.bf16.msra.mxu1 %v5823_v59 }
 0x459   : > { %5249 = vmatprep.subr.bf16.mxu1 %v5824_v60 }
 0x45c   : > { %5250 = vmatpush3.bf16.msra.mxu1 %v5825_v61 }
 0x45d   : > { %5251 = vmatprep.subr.bf16.mxu1 %v5826_v62 }
 0x460   : > { %5252 = vmatpush3.bf16.msra.mxu1 %v5827_v63 }
 0x461   : > { %5253 = vmatprep.subr.bf16.mxu1 %v5828_v0 }
 0x464   : > { %5254 = vmatpush3.bf16.msra.mxu1 %v5829_v2 }
 0x465   : > { %5288 = vmatprep.subr.bf16.mxu1 %v5841_v38  ;;  %v5833_v38 = vld [vmem:[%s7112_s7 + $0x18] sm:$0xff]  }
 0x467   : > { %3445 = vmatmul.mubr.bf16.vlgmr.msra.gmra.mrb[132].mxu1 %v2640_v27 }
 0x468   : > { %3452 = vmatprep.mubr.bf16.mxu1 %v2643_v34  ;;  %5289 = vmatpush3.bf16.msra.mxu1 %v5842_v40  ;;  %v5835_v40 = vld [vmem:[%s7112_s7 + $0x28] sm:$0xff]  }
 0x469   : > { %5290 = vmatprep.subr.bf16.mxu1 %v5843_v41  ;;  %v5836_v41 = vld [vmem:[%s7112_s7 + $0x30] sm:$0xff]  }
 0x46c   : > { %5291 = vmatpush3.bf16.msra.mxu1 %v5844_v43  ;;  %v5838_v43 = vld [vmem:[%s7112_s7 + $0x40] sm:$0xff]  }
 0x46d   : > { %5292 = vmatprep.subr.bf16.mxu1 %v5846_v44  ;;  %v5855_v44 = vld [vmem:[%s7113_s8 + $0x68] sm:$0xff]  }
 0x46f   : > { %3453 = vmatmul.mubr.bf16.gmra.mrb[136].mxu1 %v2641_v24 }
 0x470   : > { %5293 = vmatpush3.bf16.msra.mxu1 %v5848_v46  ;;  %v5857_v46 = vld [vmem:[%s7113_s8 + $0x70] sm:$0xff]  }
 0x471   : > { %5294 = vmatprep.subr.bf16.mxu1 %v5849_v48  ;;  %v5859_v48 = vld [vmem:[%s7113_s8 + $0x158] sm:$0xff]  }
 0x474   : > { %5295 = vmatpush3.bf16.msra.mxu1 %v5850_v54  ;;  %v5866_v54 = vld [vmem:[%s7113_s8 + $0x120] sm:$0xff]  }
 0x475   : > { %5296 = vmatprep.subr.bf16.mxu1 %v5851_v55  ;;  %v5871_v55 = vld [vmem:[%s7113_s8 + $0x168] sm:$0xff]  }
 0x478   : > { %5297 = vmatpush3.bf16.msra.mxu1 %v5853_v58  ;;  %v5880_v58 = vld [vmem:[%s7113_s8 + $0x130] sm:$0xff]  }
 0x479   : > { %5298 = vmatprep.subr.bf16.mxu1 %v5855_v44  ;;  %v5888_v44 = vld [vmem:[%s7113_s8 + $0x180] sm:$0xff]  }
 0x4da   : > { %v5171_v4 = vpop.f32.mrb[108].mxu1 }
 0x4db   : > { %v5172_v1 = vpop.f32.mrb[109].mxu1 }
 0x4dc   : > { %v5173_v5 = vadd.f32 %v5172_v1, %v5171_v4  ;;  %v5174_v7 = vpop.f32.mrb[110].mxu1 }
 0x4dd   : > { %v5175_v8 = vpop.f32.mrb[111].mxu1 }
 0x4de   : > { %v5176_v6 = vadd.f32 %v5175_v8, %v5174_v7  ;;  %v3300_v17 = vadd.f32 %v5173_v5, %v4793_v15 }
 0x4e0   : > { %v3303_v22 = vadd.f32 %v5176_v6, %v4793_v15 }
 0x4e2   : > { %v5177_v9 = vpop.f32.mrb[112].mxu1 }
 0x4e3   : > { %v5178_v10 = vpop.f32.mrb[113].mxu1 }
 0x4e4   : > { %v5179_v11 = vadd.f32 %v5178_v10, %v5177_v9  ;;  %v5180_v12 = vpop.f32.mrb[114].mxu1 }
 0x4e5   : > { %v5181_v14 = vpop.f32.mrb[115].mxu1 }
 0x4e6   : > { %v5182_v13 = vadd.f32 %v5181_v14, %v5180_v12  ;;  %v3308_v28 = vadd.f32 %v5179_v11, %v4793_v15 }
 0x4e8   : > { %v3311_v32 = vadd.f32 %v5182_v13, %v4793_v15 }
 0x4fa   : > { %v5199_v16 = vpop.f32.mrb[116].mxu1 }
 0x4fb   : > { %v5200_v18 = vpop.f32.mrb[117].mxu1 }
 0x4fc   : > { %v5201_v19 = vadd.f32 %v5200_v18, %v5199_v16  ;;  %v5202_v20 = vpop.f32.mrb[118].mxu1 }
 0x4fd   : > { %v5203_v21 = vpop.f32.mrb[119].mxu1 }
 0x4fe   : > { %v3349_v23 = vadd.f32 %v5201_v19, %v3300_v17  ;;  %v5204_v24 = vadd.f32 %v5203_v21, %v5202_v20 }
 0x500   : > { %v3352_v25 = vadd.f32 %v5204_v24, %v3303_v22 }
 0x502   : > { %v5205_v26 = vpop.f32.mrb[120].mxu1 }
 0x503   : > { %v5206_v27 = vpop.f32.mrb[121].mxu1 }
 0x504   : > { %v5207_v29 = vadd.f32 %v5206_v27, %v5205_v26  ;;  %v5208_v30 = vpop.f32.mrb[122].mxu1 }
 0x505   : > { %v5209_v31 = vpop.f32.mrb[123].mxu1 }
 0x506   : > { %v3357_v33 = vadd.f32 %v5207_v29, %v3308_v28  ;;  %v5210_v34 = vadd.f32 %v5209_v31, %v5208_v30  ;;  %v5839_v28 = vld [vmem:[%s7113_s8 + $0x140] sm:$0xff]  }
 0x507   : > { %v5830_v30 = vld [vmem:[%s7112_s7] sm:$0xff]  }
 0x508   : > { %v3360_v35 = vadd.f32 %v5210_v34, %v3311_v32  ;;  %v5840_v31 = vld [vmem:[%s7113_s8 + $0x100] sm:$0xff]   ;;  %v5845_v32 = vld [vmem:[%s7113_s8 + $0x148] sm:$0xff]   ;;  %v5852_v34 = vld [vmem:[%s7113_s8 + $0x150] sm:$0xff]  }
 0x512   : > { %v5471_v36 = vpop.f32.mrb[144].mxu0 }
 0x513   : > { %v3495_v37 = vpop.f32.mrb[145].mxu0 }
 0x514   : > { %v5472_v39 = vpop.f32.mrb[146].mxu0 }
 0x515   : > { %v3498_v42 = vpop.f32.mrb[147].mxu0 }
 0x51a   : > { %v5227_v45 = vpop.f32.mrb[124].mxu1 }
 0x51b   : > { %v5228_v47 = vpop.f32.mrb[125].mxu1 }
 0x51c   : > { %v5229_v49 = vadd.f32 %v5228_v47, %v5227_v45  ;;  %v5230_v50 = vpop.f32.mrb[126].mxu1  ;;  %v5856_v45 = vld [vmem:[%s7113_s8 + $0x28] sm:$0xff]   ;;  %v5858_v47 = vld [vmem:[%s7113_s8 + $0x30] sm:$0xff]  }
 0x51d   : > { %v5231_v51 = vpop.f32.mrb[127].mxu1  ;;  %5299 = vmatpush3.bf16.msra.mxu1 %v5856_v45  ;;  %v5889_v45 = vld [vmem:[%s7113_s8 + $0x200] sm:$0xff]  }
 0x51e   : > { %v3398_v52 = vadd.f32 %v5229_v49, %v3349_v23  ;;  %v5232_v53 = vadd.f32 %v5231_v51, %v5230_v50  ;;  %v5860_v49 = vld [vmem:[%s7113_s8 + $0x118] sm:$0xff]   ;;  %5300 = vmatprep.subr.bf16.mxu1 %v5857_v46  ;;  %v5890_v46 = vld [vmem:[%s7113_s8 + $0x1c8] sm:$0xff]  }
 0x51f   : > { %v5861_v50 = vld [vmem:[%s7113_s8 + $0x78] sm:$0xff]  }
 0x520   : > { %v3401_v56 = vadd.f32 %v5232_v53, %v3352_v25  ;;  %v5862_v51 = vld [vmem:[%s7113_s8 + $0x38] sm:$0xff]   ;;  %v5865_v53 = vld [vmem:[%s7113_s8 + $0x160] sm:$0xff]  }
 0x521   : > { %5301 = vmatpush3.bf16.msra.mxu1 %v5858_v47  ;;  %v5891_v47 = vld [vmem:[%s7113_s8 + $0x188] sm:$0xff]  }
 0x522   : > { %v5233_v57 = vpop.f32.mrb[128].mxu1  ;;  %5302 = vmatprep.subr.bf16.mxu1 %v5861_v50 }
 0x523   : > { %v5234_v59 = vpop.f32.mrb[129].mxu1 }
 0x524   : > { %v5235_v60 = vadd.f32 %v5234_v59, %v5233_v57  ;;  %v5236_v61 = vpop.f32.mrb[130].mxu1  ;;  %v5878_v57 = vld [vmem:[%s7113_s8 + $0x170] sm:$0xff]   ;;  %v5885_v59 = vld [vmem:[%s7113_s8 + $0x178] sm:$0xff]  }
 0x525   : > { %v5237_v62 = vpop.f32.mrb[131].mxu1  ;;  %5303 = vmatpush3.bf16.msra.mxu1 %v5862_v51 }
 0x526   : > { %v3406_v63 = vadd.f32 %v5235_v60, %v3357_v33  ;;  %v5238_v0 = vadd.f32 %v5237_v62, %v5236_v61  ;;  %v5847_v33 = vld [vmem:[%s7113_s8 + $0x108] sm:$0xff]   ;;  %v5886_v60 = vld [vmem:[%s7113_s8 + $0x138] sm:$0xff]  }
 0x528   : > { %v3409_v2 = vadd.f32 %v5238_v0, %v3360_v35  ;;  %v5831_v35 = vld [vmem:[%s7112_s7 + $0x8] sm:$0xff]  }
 0x53a   : > { %v5255_v4 = vpop.f32.mrb[132].mxu1 }
 0x53b   : > { %v5256_v1 = vpop.f32.mrb[133].mxu1 }
 0x53c   : > { %v5257_v5 = vadd.f32 %v5256_v1, %v5255_v4  ;;  %v5258_v7 = vpop.f32.mrb[134].mxu1 }
 0x53d   : > { %v5259_v8 = vpop.f32.mrb[135].mxu1 }
 0x53e   : > { %v3447_v6 = vadd.f32 %v5257_v5, %v3398_v52  ;;  %v5260_v9 = vadd.f32 %v5259_v8, %v5258_v7  ;;  %v5863_v52 = vld [vmem:[%s7113_s8 + $0xc0] sm:$0xff]  }
 0x53f   : > { %5310 = vmatprep.subr.bf16.mxu1 %v5863_v52 }
 0x540   : > { %v3496_v10 = vadd.f32 %v3495_v37, %v3447_v6  ;;  %v3450_v11 = vadd.f32 %v5260_v9, %v3401_v56  ;;  %v5832_v37 = vld [vmem:[%s7112_s7 + $0x10] sm:$0xff]   ;;  %v5873_v56 = vld [vmem:[%s7113_s8 + $0x128] sm:$0xff]   ;;  %v5864_v6 = vld [vmem:[%s7113_s8 + $0x80] sm:$0xff]  }
 0x541   : > { %v5867_v9 = vld [vmem:[%s7113_s8 + $0xc8] sm:$0xff]  }
 0x542   : > { %v3499_v12 = vadd.f32 %v3498_v42, %v3450_v11  ;;  %v5261_v14 = vpop.f32.mrb[136].mxu1  ;;  %v3510_v15 = vmax.f32 %v3496_v10, 0.0  ;;  %v5837_v42 = vld [vmem:[%s7112_s7 + $0x38] sm:$0xff]   ;;  %v5868_v10 = vld [vmem:[%s7113_s8 + $0x88] sm:$0xff]  }
 0x543   : > { %v5262_v13 = vpop.f32.mrb[137].mxu1 }
 0x544   : > { %v3511_v16 = vmax.f32 %v3499_v12, 0.0  ;;  %v5263_v18 = vadd.f32 %v5262_v13, %v5261_v14  ;;  %v5264_v17 = vpop.f32.mrb[138].mxu1  ;;  %v5869_v12 = vld [vmem:[%s7113_s8 + $0xd0] sm:$0xff]  }
 0x545   : > { %v5265_v19 = vpop.f32.mrb[139].mxu1 }
 0x546   : > { %v3514_v20 = vpack.c.bf16 %v3511_v16, %v3510_v15  ;;  %v3455_v21 = vadd.f32 %v5263_v18, %v3406_v63  ;;  %v5266_v22 = vadd.f32 %v5265_v19, %v5264_v17  ;;  %v5870_v18 = vld [vmem:[%s7113_s8 + $0x90] sm:$0xff]   ;;  %v5872_v17 = vld [vmem:[%s7113_s8 + $0xd8] sm:$0xff]  }
 0x547   : > { %v5874_v19 = vld [vmem:[%s7113_s8 + $0x98] sm:$0xff]  }
 0x548   : > { %v3504_v23 = vadd.f32 %v5471_v36, %v3455_v21  ;;  %v3458_v24 = vadd.f32 %v5266_v22, %v3409_v2  ;;  %5474 = vmatpush3.bf16.msra.mxu0 %v3514_v20  ;;  %v5854_v36 = vld [vmem:[%s7113_s8 + $0x110] sm:$0xff]   ;;  %v5875_v21 = vld [vmem:[%s7113_s8 + $0xe0] sm:$0xff]  }
 0x549   : > { %5475 = vmatprep.subr.bf16.mxu0 %v5920_v3 }
 0x54a   : > { %v3507_v25 = vadd.f32 %v5472_v39, %v3458_v24  ;;  %v3512_v26 = vmax.f32 %v3504_v23, 0.0  ;;  %v5834_v39 = vld [vmem:[%s7112_s7 + $0x20] sm:$0xff]  }
 0x54c   : > { %v3513_v27 = vmax.f32 %v3507_v25, 0.0 }
 0x54e   : > { %v3515_v29 = vpack.c.bf16 %v3513_v27, %v3512_v26  ;;  %v5876_v26 = vld [vmem:[%s7113_s8 + $0xa0] sm:$0xff]   ;;  %v5877_v27 = vld [vmem:[%s7113_s8 + $0xe8] sm:$0xff]  }
 0x550   : > { %5476 = vmatpush3.bf16.msra.mxu0 %v3515_v29 }
 0x551   : > { %5332 = vmatprep.subr.bf16.mxu0 %v5839_v28  ;;  %v5879_v28 = vld [vmem:[%s7113_s8 + $0xa8] sm:$0xff]  }
 0x553   : > { %5478 = vmatmul.mubr.msk.bf16.vlgmr.msra.gmra.mrb[148].mxu0 %vm3579_vm2, %v5830_v30  ;;  %v5881_v30 = vld [vmem:[%s7113_s8 + $0xf0] sm:$0xff]  }
 0x554   : > { %5481 = vmatprep.mubr.msk.bf16.mxu0 %vm5921_vm1, %v5920_v3  ;;  %5333 = vmatpush3.bf16.msra.mxu0 %v5840_v31 }
 0x555   : > { %5334 = vmatprep.subr.bf16.mxu0 %v5845_v32 }
 0x558   : > { %5335 = vmatpush3.bf16.msra.mxu0 %v5847_v33 }
 0x559   : > { %5336 = vmatprep.subr.bf16.mxu0 %v5852_v34 }
 0x55b   : > { %5482 = vmatmul.mubr.msk.bf16.gmra.mrb[152].mxu0 %vm3579_vm2, %v5831_v35  ;;  %v5882_v35 = vld [vmem:[%s7113_s8 + $0xb0] sm:$0xff]  }
 0x55c   : > { %5485 = vmatprep.mubr.msk.bf16.mxu0 %vm5921_vm1, %v5920_v3  ;;  %5337 = vmatpush3.bf16.msra.mxu0 %v5854_v36  ;;  %v5883_v36 = vld [vmem:[%s7113_s8 + $0xf8] sm:$0xff]  }
 0x55d   : > { %5338 = vmatprep.subr.bf16.mxu0 %v5859_v48  ;;  %v5892_v48 = vld [vmem:[%s7113_s8 + $0x208] sm:$0xff]  }
 0x560   : > { %5339 = vmatpush3.bf16.msra.mxu0 %v5860_v49  ;;  %v5893_v49 = vld [vmem:[%s7113_s8 + $0x1d0] sm:$0xff]  }
 0x561   : > { %5340 = vmatprep.subr.bf16.mxu0 %v5865_v53  ;;  %v5894_v53 = vld [vmem:[%s7113_s8 + $0x190] sm:$0xff]  }
 0x563   : > { %5486 = vmatmul.mubr.msk.bf16.gmra.mrb[156].mxu0 %vm3579_vm2, %v5832_v37  ;;  %v5884_v37 = vld [vmem:[%s7113_s8 + $0xb8] sm:$0xff]  }
 0x564   : > { %5489 = vmatprep.mubr.msk.bf16.mxu0 %vm5921_vm1, %v5920_v3  ;;  %5341 = vmatpush3.bf16.msra.mxu0 %v5866_v54  ;;  %v5895_v54 = vld [vmem:[%s7113_s8 + $0x210] sm:$0xff]  }
 0x565   : > { %5342 = vmatprep.subr.bf16.mxu0 %v5871_v55 }
 0x568   : > { %5343 = vmatpush3.bf16.msra.mxu0 %v5873_v56 }
 0x569   : > { %5344 = vmatprep.subr.bf16.mxu0 %v5878_v57  ;;  %v5896_v57 = vld [vmem:[%s7113_s8 + $0x1d8] sm:$0xff]  }
 0x56b   : > { %5490 = vmatmul.mubr.msk.bf16.gmra.mrb[160].mxu0 %vm3579_vm2, %v5833_v38 }
 0x56c   : > { %5493 = vmatprep.mubr.msk.bf16.mxu0 %vm5921_vm1, %v5920_v3  ;;  %5345 = vmatpush3.bf16.msra.mxu0 %v5880_v58  ;;  %v5897_v58 = vld [vmem:[%s7113_s8 + $0x198] sm:$0xff]  }
 0x56d   : > { %5346 = vmatprep.subr.bf16.mxu0 %v5885_v59  ;;  %v5898_v59 = vld [vmem:[%s7113_s8 + $0x218] sm:$0xff]  }
 0x570   : > { %5347 = vmatpush3.bf16.msra.mxu0 %v5886_v60  ;;  %v5899_v60 = vld [vmem:[%s7113_s8 + $0x1e0] sm:$0xff]  }
 0x571   : > { %5513 = vmatprep.subr.bf16.mxu0 %v5920_v3 }
 0x573   : > { %5494 = vmatmul.mubr.msk.bf16.gmra.mrb[164].mxu0 %vm3579_vm2, %v5834_v39  ;;  %v5887_v39 = vld [vmem:[%s7113_s8 + $0x1c0] sm:$0xff]  }
 0x574   : > { %5497 = vmatprep.mubr.msk.bf16.mxu0 %vm5921_vm1, %v5920_v3 }
 0x57b   : > { %5498 = vmatmul.mubr.msk.bf16.gmra.mrb[168].mxu0 %vm3579_vm2, %v5835_v40 }
 0x57c   : > { %5501 = vmatprep.mubr.msk.bf16.mxu0 %vm5921_vm1, %v5920_v3 }
 0x583   : > { %5502 = vmatmul.mubr.msk.bf16.gmra.mrb[172].mxu0 %vm3579_vm2, %v5836_v41 }
 0x584   : > { %5505 = vmatprep.mubr.msk.bf16.mxu0 %vm5921_vm1, %v5920_v3 }
 0x58b   : > { %5506 = vmatmul.mubr.msk.bf16.gmra.mrb[176].mxu0 %vm3579_vm2, %v5837_v42 }
 0x58c   : > { %5509 = vmatprep.mubr.msk.bf16.mxu0 %vm5921_vm1, %v5920_v3 }
 0x593   : > { %5510 = vmatmul.mubr.msk.bf16.gmra.mrb[180].mxu0 %vm3579_vm2, %v5838_v43 }
 0x626   : > { %v3641_v61 = vpop.f32.mrb[148].mxu0 }
 0x627   : > { %v5479_v62 = vpop.f32.mrb[149].mxu0 }
 0x628   : > { %v3644_v63 = vpop.f32.mrb[150].mxu0 }
 0x629   : > { %v3712_v0 = vpack.c.bf16 %v3644_v63, %v3641_v61  ;;  %v5480_v2 = vpop.f32.mrb[151].mxu0 }
 0x62a   : > { %v5901_v2 = vld [vmem:[%s7113_s8 + $0x220] sm:$0xff]  }
 0x62e   : > { %v3649_v4 = vpop.f32.mrb[152].mxu0 }
 0x62f   : > { %v5483_v1 = vpop.f32.mrb[153].mxu0 }
 0x630   : > { %v3652_v5 = vpop.f32.mrb[154].mxu0 }
 0x631   : > { %v3713_v7 = vpack.c.bf16 %v3652_v5, %v3649_v4  ;;  %v5484_v8 = vpop.f32.mrb[155].mxu0  ;;  %v5902_v5 = vld [vmem:[%s7113_s8 + $0x1e8] sm:$0xff]  }
 0x632   : > { %v5904_v8 = vld [vmem:[%s7113_s8 + $0x228] sm:$0xff]  }
 0x633   : > { %4354 = vmatprep.mubr.bf16.mxu1 %v3713_v7  ;;  %v5903_v7 = vld [vmem:[%s7113_s8 + $0x1a8] sm:$0xff]  }
 0x634   : > { %4355 = vmatmul.mubr.bf16.vlgmr.msra.gmra.mrb[140].mxu1 %v3712_v0  ;;  %v5900_v0 = vld [vmem:[%s7113_s8 + $0x1a0] sm:$0xff]  }
 0x635   : > { %5311 = vmatpush3.bf16.msra.mxu1 %v5864_v6  ;;  %v5905_v6 = vld [vmem:[%s7113_s8 + $0x1f0] sm:$0xff]  }
 0x636   : > { %5312 = vmatprep.subr.bf16.mxu1 %v5867_v9  ;;  %v3657_v11 = vpop.f32.mrb[156].mxu0 }
 0x637   : > { %v5487_v14 = vpop.f32.mrb[157].mxu0 }
 0x638   : > { %v3660_v13 = vpop.f32.mrb[158].mxu0  ;;  %v5907_v14 = vld [vmem:[%s7113_s8 + $0x230] sm:$0xff]  }
 0x639   : > { %5313 = vmatpush3.bf16.msra.mxu1 %v5868_v10  ;;  %v3714_v15 = vpack.c.bf16 %v3660_v13, %v3657_v11  ;;  %v5488_v16 = vpop.f32.mrb[159].mxu0 }
 0x63a   : > { %5314 = vmatprep.subr.bf16.mxu1 %v5869_v12  ;;  %v5906_v12 = vld [vmem:[%s7113_s8 + $0x1b0] sm:$0xff]   ;;  %v5908_v16 = vld [vmem:[%s7113_s8 + $0x1f8] sm:$0xff]  }
 0x63d   : > { %5315 = vmatpush3.bf16.msra.mxu1 %v5870_v18  ;;  %v5909_v18 = vld [vmem:[%s7113_s8 + $0x1b8] sm:$0xff]  }
 0x63e   : > { %5316 = vmatprep.subr.bf16.mxu1 %v5872_v17  ;;  %v3665_v20 = vpop.f32.mrb[160].mxu0  ;;  %v5910_v17 = vld [vmem:[%s7113_s8 + $0x238] sm:$0xff]  }
 0x63f   : > { %v5491_v22 = vpop.f32.mrb[161].mxu0 }
 0x640   : > { %v3668_v23 = vpop.f32.mrb[162].mxu0 }
 0x641   : > { %5317 = vmatpush3.bf16.msra.mxu1 %v5874_v19  ;;  %v3715_v24 = vpack.c.bf16 %v3668_v23, %v3665_v20  ;;  %v5492_v25 = vpop.f32.mrb[163].mxu0 }
 0x642   : > { %5318 = vmatprep.subr.bf16.mxu1 %v5875_v21  ;;  %v4884_v25 = vld [vmem:[%s7114_s9] ss:$0 sm:$0xff] }
 0x643   : > { %4395 = vmatprep.mubr.bf16.mxu1 %v3715_v24 }
 0x645   : > { %5319 = vmatpush3.bf16.msra.mxu1 %v5876_v26 }
 0x646   : > { %5320 = vmatprep.subr.bf16.mxu1 %v5877_v27  ;;  %v3673_v29 = vpop.f32.mrb[164].mxu0 }
 0x647   : > { %v5495_v31 = vpop.f32.mrb[165].mxu0 }
 0x648   : > { %v3676_v32 = vpop.f32.mrb[166].mxu0 }
 0x649   : > { %5321 = vmatpush3.bf16.msra.mxu1 %v5879_v28  ;;  %v3716_v33 = vpack.c.bf16 %v3676_v32, %v3673_v29  ;;  %v5496_v34 = vpop.f32.mrb[167].mxu0 }
 0x64a   : > { %5322 = vmatprep.subr.bf16.mxu1 %v5881_v30 }
 0x64d   : > { %5323 = vmatpush3.bf16.msra.mxu1 %v5882_v35 }
 0x64e   : > { %v3681_v38 = vpop.f32.mrb[168].mxu0  ;;  %5324 = vmatprep.subr.bf16.mxu1 %v5883_v36 }
 0x64f   : > { %v5499_v40 = vpop.f32.mrb[169].mxu0 }
 0x650   : > { %v3684_v41 = vpop.f32.mrb[170].mxu0 }
 0x651   : > { %v3717_v42 = vpack.c.bf16 %v3684_v41, %v3681_v38  ;;  %5325 = vmatpush3.bf16.msra.mxu1 %v5884_v37  ;;  %v5500_v43 = vpop.f32.mrb[171].mxu0 }
 0x652   : > { %5354 = vmatprep.subr.bf16.mxu1 %v5887_v39 }
 0x653   : > { %4436 = vmatprep.mubr.bf16.mxu0 %v3717_v42 }
 0x654   : > { %4396 = vmatmul.mubr.bf16.vlgmr.msra.gmra.mrb[144].mxu1 %v3714_v15  ;;  %4437 = vmatmul.mubr.bf16.vlgmr.msra.gmra.mrb[184].mxu0 %v3716_v33 }
 0x655   : > { %5355 = vmatpush3.bf16.msra.mxu1 %v5888_v44  ;;  %5514 = vmatpush3.bf16.msra.mxu0 %v5889_v45 }
 0x656   : > { %5356 = vmatprep.subr.bf16.mxu1 %v5890_v46  ;;  %5515 = vmatprep.subr.bf16.mxu0 %v5920_v3  ;;  %v3689_v50 = vpop.f32.mrb[172].mxu0 }
 0x657   : > { %v5503_v51 = vpop.f32.mrb[173].mxu0  ;;  %5529 = vmatprep.mubr.msk.bf16.mxu0 %vm5921_vm1, %v5920_v3 }
 0x658   : > { %v3692_v52 = vpop.f32.mrb[174].mxu0 }
 0x659   : > { %5357 = vmatpush3.bf16.msra.mxu1 %v5891_v47  ;;  %5516 = vmatpush3.bf16.msra.mxu0 %v5892_v48  ;;  %v3718_v55 = vpack.c.bf16 %v3692_v52, %v3689_v50  ;;  %v5504_v56 = vpop.f32.mrb[175].mxu0 }
 0x65a   : > { %5358 = vmatprep.subr.bf16.mxu1 %v5893_v49  ;;  %5517 = vmatprep.subr.bf16.mxu0 %v5920_v3 }
 0x65d   : > { %5359 = vmatpush3.bf16.msra.mxu1 %v5894_v53  ;;  %5518 = vmatpush3.bf16.msra.mxu0 %v5895_v54 }
 0x65e   : > { %5360 = vmatprep.subr.bf16.mxu1 %v5896_v57  ;;  %5519 = vmatprep.subr.bf16.mxu0 %v5920_v3  ;;  %v3697_v61 = vpop.f32.mrb[176].mxu0 }
 0x65f   : > { %v5507_v62 = vpop.f32.mrb[177].mxu0 }
 0x660   : > { %v3700_v63 = vpop.f32.mrb[178].mxu0 }
 0x661   : > { %5361 = vmatpush3.bf16.msra.mxu1 %v5897_v58  ;;  %5520 = vmatpush3.bf16.msra.mxu0 %v5898_v59  ;;  %v3719_v4 = vpack.c.bf16 %v3700_v63, %v3697_v61  ;;  %v5508_v1 = vpop.f32.mrb[179].mxu0 }
 0x662   : > { %5362 = vmatprep.subr.bf16.mxu1 %v5899_v60  ;;  %5521 = vmatprep.subr.bf16.mxu0 %v5920_v3 }
 0x663   : > { %4477 = vmatprep.mubr.bf16.mxu1 %v3719_v4 }
 0x665   : > { %5363 = vmatpush3.bf16.msra.mxu1 %v5900_v0  ;;  %5522 = vmatpush3.bf16.msra.mxu0 %v5901_v2 }
 0x666   : > { %5364 = vmatprep.subr.bf16.mxu1 %v5902_v5  ;;  %5523 = vmatprep.subr.bf16.mxu0 %v5920_v3  ;;  %v3705_v9 = vpop.f32.mrb[180].mxu0 }
 0x667   : > { %v5511_v10 = vpop.f32.mrb[181].mxu0 }
 0x668   : > { %v3708_v11 = vpop.f32.mrb[182].mxu0 }
 0x669   : > { %5365 = vmatpush3.bf16.msra.mxu1 %v5903_v7  ;;  %5524 = vmatpush3.bf16.msra.mxu0 %v5904_v8  ;;  %v3720_v13 = vpack.c.bf16 %v3708_v11, %v3705_v9  ;;  %v5512_v15 = vpop.f32.mrb[183].mxu0 }
 0x66a   : > { %5366 = vmatprep.subr.bf16.mxu1 %v5905_v6  ;;  %5525 = vmatprep.subr.bf16.mxu0 %v5920_v3 }
 0x66d   : > { %5367 = vmatpush3.bf16.msra.mxu1 %v5906_v12  ;;  %5526 = vmatpush3.bf16.msra.mxu0 %v5907_v14 }
 0x66e   : > { %5368 = vmatprep.subr.bf16.mxu1 %v5908_v16  ;;  %5527 = vmatprep.subr.bf16.mxu0 %v5920_v3 }
 0x671   : > { %5369 = vmatpush3.bf16.msra.mxu1 %v5909_v18  ;;  %5528 = vmatpush3.bf16.msra.mxu0 %v5910_v17 }
 0x674   : > { %4478 = vmatmul.mubr.bf16.vlgmr.msra.gmra.mrb[148].mxu1 %v3718_v55  ;;  %5530 = vmatmul.mubr.bf16.vlgmr.msra.gmra.mrb[188].mxu0 %v3720_v13 }
 0x707   : > { %v5304_v19 = vpop.f32.mrb[140].mxu1 }
 0x708   : > { %v5305_v20 = vpop.f32.mrb[141].mxu1 }
 0x709   : > { %v5306_v21 = vadd.f32 %v5305_v20, %v5304_v19  ;;  %v5307_v22 = vpop.f32.mrb[142].mxu1 }
 0x70a   : > { %v5308_v23 = vpop.f32.mrb[143].mxu1 }
 0x70b   : > { %v5309_v24 = vadd.f32 %v5308_v23, %v5307_v22  ;;  %v4357_v30 = vadd.f32 %v5306_v21, %v4884_v25 }
 0x70d   : > { %v4360_v36 = vadd.f32 %v5309_v24, %v4884_v25 }
 0x727   : > { %v5326_v26 = vpop.f32.mrb[144].mxu1  ;;  %v5348_v27 = vpop.f32.mrb[184].mxu0 }
 0x728   : > { %v5327_v28 = vpop.f32.mrb[145].mxu1  ;;  %v5349_v29 = vpop.f32.mrb[185].mxu0 }
 0x729   : > { %v5328_v3 = vadd.f32 %v5327_v28, %v5326_v26  ;;  %v5329_v31 = vpop.f32.mrb[146].mxu1  ;;  %v5350_v32 = vadd.f32 %v5349_v29, %v5348_v27  ;;  %v5351_v33 = vpop.f32.mrb[186].mxu0 }
 0x72a   : > { %v5330_v34 = vpop.f32.mrb[147].mxu1  ;;  %v5352_v35 = vpop.f32.mrb[187].mxu0 }
 0x72b   : > { %v4398_v37 = vadd.f32 %v5328_v3, %v4357_v30  ;;  %v5331_v38 = vadd.f32 %v5330_v34, %v5329_v31  ;;  %v5353_v39 = vadd.f32 %v5352_v35, %v5351_v33 }
 0x72d   : > { %v4439_v40 = vadd.f32 %v5350_v32, %v4398_v37  ;;  %v4401_v41 = vadd.f32 %v5331_v38, %v4360_v36 }
 0x72f   : > { %v4442_v42 = vadd.f32 %v5353_v39, %v4401_v41 }
 0x747   : > { %v5370_v43 = vpop.f32.mrb[148].mxu1  ;;  %v4520_v44 = vpop.f32.mrb[188].mxu0 }
 0x748   : > { %v5371_v45 = vpop.f32.mrb[149].mxu1  ;;  %v5531_v46 = vpop.f32.mrb[189].mxu0 }
 0x749   : > { %v5372_v47 = vadd.f32 %v5371_v45, %v5370_v43  ;;  %v5373_v48 = vpop.f32.mrb[150].mxu1  ;;  %v4523_v49 = vpop.f32.mrb[190].mxu0 }
 0x74a   : > { %v5374_v50 = vpop.f32.mrb[151].mxu1  ;;  %v5532_v51 = vpop.f32.mrb[191].mxu0 }
 0x74b   : > { %v4480_v52 = vadd.f32 %v5372_v47, %v4439_v40  ;;  %v5375_v53 = vadd.f32 %v5374_v50, %v5373_v48 }
 0x74d   : > { %v4521_v54 = vadd.f32 %v4520_v44, %v4480_v52  ;;  %v4483_v55 = vadd.f32 %v5375_v53, %v4442_v42 }
 0x74f   : > { %v4527_v56 = vmax.f32 %v4521_v54, 0.0  ;;  %v4524_v57 = vadd.f32 %v4523_v49, %v4483_v55 }
 0x751   : > { %4530 = vst.msk [vmem:[%s359_s28] sm:$0xff] %vm4529_vm3, %v4527_v56  ;;  %v4528_v58 = vmax.f32 %v4524_v57, 0.0 }
 0x753   : > { %4531 = vst.msk [vmem:[%s359_s28 + $0x8] sm:$0xff] %vm4529_vm3, %v4528_v58 }
 0x754 PF: > { %s20_s13 = sadd.s32 1, %s5917_s13  }
 0x755   : > { %p17_p4 = scmp.ge.s32.totalorder %s20_s13, 4  }
 0x757   :  { %19 = sbr.rel (!%p17_p4) target bundleno = 1 (0x1), region = 90 }

</bundles_post_ra>
